<compile_context>
chip_gen: v7x
topology: tpu7x:2x2x1
jax: 0.10.0
libtpu: 0.0.40
codegen_flags: <defaults>
</compile_context>

<pallas_src>
import functools

import jax
import jax.numpy as jnp
from jax.experimental import pallas as pl
from jax.experimental.pallas import tpu as pltpu

EPS = 1e-5  # nn.BatchNorm2d default


def _vmem_limit_bytes():
    """Per-generation scoped-VMEM budget: ~75% of physical (v5e/v6e: ~96 MiB,
    v7x: ~48 MiB), capped at 100 MiB, with a conservative 32 MiB fallback."""
    try:
        cap = pltpu.get_tpu_info().vmem_capacity_bytes
        return min(int(cap * 3 // 4), 100 * 1024 * 1024)
    except Exception:
        return 32 * 1024 * 1024


# ----------------------------------------------------------------------------
# Fused kernel: [optional BN+ReLU of the previous stage folded into the input
# load] -> 3x3 conv (zero halo in VMEM scratch, 9 bf16 block-diagonal
# lane-dense MXU matmuls into an f32 vreg accumulator, single store) ->
# per-block BN partial statistics.
# ----------------------------------------------------------------------------
def _fused_conv_kernel(x_ref, scale_ref, shift_ref, wbd_ref, b_ref,
                       y_ref, psum_ref, psq_ref, xpad_ref,
                       *, cin, fuse_input_bnrelu):
    nt, H, wc_out = y_ref.shape          # Nt images, H rows, W*Cout lanes
    wc_in = x_ref.shape[2]               # W*Cin
    wc_pad = xpad_ref.shape[2]           # (W+2)*Cin
    M = nt * H

    x = x_ref[...]                                            # (Nt, H, W*Cin) f32
    if fuse_input_bnrelu:
        # Fold the previous stage's BatchNorm (precomputed scale/shift) + ReLU
        # into this conv's input load; elementwise math stays f32.
        x = jnp.maximum(x * scale_ref[...] + shift_ref[...], 0.0)

    # 1-pixel zero halo: re-zero only the border strips each step (interior is
    # fully overwritten below). Border zeroing is repeated every step so it is
    # correct under "parallel" semantics on multi-core parts.
    xpad_ref[:, 0:1, :] = jnp.zeros((nt, 1, wc_pad), jnp.float32)
    xpad_ref[:, H + 1:H + 2, :] = jnp.zeros((nt, 1, wc_pad), jnp.float32)
    xpad_ref[:, :, 0:cin] = jnp.zeros((nt, H + 2, cin), jnp.float32)
    xpad_ref[:, :, cin + wc_in:cin + wc_in + cin] = (
        jnp.zeros((nt, H + 2, cin), jnp.float32))
    xpad_ref[:, 1:H + 1, cin:cin + wc_in] = x

    # Hoist the kw lane-shifts out of the 3x3 loop: three shifted slabs, cast
    # once each to bf16 (MXU-native), reused for the 3 kh taps.
    xsh = [xpad_ref[:, :, kw * cin:kw * cin + wc_in].astype(jnp.bfloat16)
           for kw in range(3)]                                # 3 x (Nt, H+2, W*Cin)

    # 3x3 conv: 9 lane-dense (Nt*H, W*Cin) @ (W*Cin, W*Cout) bf16 matmuls with
    # f32 accumulation in a small vreg accumulator initialized with the bias.
    acc = jnp.broadcast_to(b_ref[...], (M, wc_out))           # (M, W*Cout) f32
    for kh in range(3):
        for kw in range(3):
            patch = xsh[kw][:, kh:kh + H, :].reshape(M, wc_in)
            acc = acc + jnp.dot(patch, wbd_ref[kh * 3 + kw],
                                preferred_element_type=jnp.float32)

    y_ref[...] = acc.reshape(nt, H, wc_out)                   # single store

    # Lane-resolved BN partial sums for this block of images; the tiny final
    # reduction over blocks/W happens in plain JAX so the grid stays parallel.
    psum_ref[...] = jnp.sum(acc, axis=0, keepdims=True).reshape(1, 1, wc_out)
    psq_ref[...] = jnp.sum(acc * acc, axis=0, keepdims=True).reshape(1, 1, wc_out)


def conv3x3_bn_stats(x2d, w, b, scale_in, shift_in, *, fuse_input_bnrelu,
                     images_per_step=None):
    """x2d: (N, H, W*Cin) f32.  w: (3,3,Cin,Cout).  b: (Cout,).
    scale_in/shift_in: (Cin,) folded BN of the previous stage (ignored when
    fuse_input_bnrelu=False).  Returns (y2d (N,H,W*Cout), mean (Cout,), var)."""
    N, H, wc_in = x2d.shape
    Cin, Cout = w.shape[2], w.shape[3]
    W = wc_in // Cin
    wc_out = W * Cout
    nt = N if images_per_step is None else images_per_step
    assert N % nt == 0
    nblk = N // nt

    # Block-diagonal per-tap weights, bf16 (MXU-native): (9, W*Cin, W*Cout).
    eye = jnp.eye(W, dtype=jnp.float32)
    wbd = jnp.einsum("ab,hwio->hwaibo", eye, w.astype(jnp.float32))
    wbd = wbd.reshape(9, wc_in, wc_out).astype(jnp.bfloat16)

    b_t = jnp.tile(b.reshape(1, Cout).astype(jnp.float32), (1, W))   # (1, W*Cout)
    sc_t = jnp.tile(scale_in.reshape(1, Cin).astype(jnp.float32), (1, W))
    sh_t = jnp.tile(shift_in.reshape(1, Cin).astype(jnp.float32), (1, W))

    kernel = functools.partial(_fused_conv_kernel, cin=Cin,
                               fuse_input_bnrelu=fuse_input_bnrelu)
    y, psum, psq = pl.pallas_call(
        kernel,
        out_shape=(jax.ShapeDtypeStruct((N, H, wc_out), jnp.float32),
                   jax.ShapeDtypeStruct((nblk, 1, wc_out), jnp.float32),
                   jax.ShapeDtypeStruct((nblk, 1, wc_out), jnp.float32)),
        grid=(nblk,),
        in_specs=[
            pl.BlockSpec((nt, H, wc_in), lambda i: (i, 0, 0)),
            pl.BlockSpec((1, wc_in), lambda i: (0, 0)),
            pl.BlockSpec((1, wc_in), lambda i: (0, 0)),
            pl.BlockSpec((9, wc_in, wc_out), lambda i: (0, 0, 0)),
            pl.BlockSpec((1, wc_out), lambda i: (0, 0)),
        ],
        out_specs=(
            pl.BlockSpec((nt, H, wc_out), lambda i: (i, 0, 0)),
            pl.BlockSpec((1, 1, wc_out), lambda i: (i, 0, 0)),
            pl.BlockSpec((1, 1, wc_out), lambda i: (i, 0, 0)),
        ),
        scratch_shapes=[pltpu.VMEM((nt, H + 2, (W + 2) * Cin), jnp.float32)],
        compiler_params=pltpu.CompilerParams(
            dimension_semantics=("parallel",),
            vmem_limit_bytes=_vmem_limit_bytes()),
    )(x2d, sc_t, sh_t, wbd, b_t)

    # Tiny final reduction of the partial sums in plain JAX.
    cnt = jnp.float32(N * H * W)
    mean = psum.reshape(nblk, W, Cout).sum(axis=(0, 1)) / cnt
    ex2 = psq.reshape(nblk, W, Cout).sum(axis=(0, 1)) / cnt
    # NOTE: E[x^2] - mean^2 (biased, PyTorch train-mode). Prefer a centered /
    # Welford pass for production-scale activations.
    var = ex2 - mean * mean
    return y, mean, var


# ----------------------------------------------------------------------------
# Lane-dense BN + ReLU epilogue for the final stage (whole batch per step).
# ----------------------------------------------------------------------------
def _bn_relu_kernel(y_ref, scale_ref, shift_ref, o_ref):
    o_ref[...] = jnp.maximum(y_ref[...] * scale_ref[...] + shift_ref[...], 0.0)


def bn_relu_epilogue(y2d, mean, var, gamma, beta, *, cout, images_per_step=None):
    N, H, wc = y2d.shape
    W = wc // cout
    nt = N if images_per_step is None else images_per_step
    nblk = N // nt
    scale = gamma.reshape(-1) * jax.lax.rsqrt(var + EPS)      # (Cout,)
    shift = beta.reshape(-1) - mean * scale
    sc_t = jnp.tile(scale.reshape(1, cout), (1, W))           # (1, W*Cout)
    sh_t = jnp.tile(shift.reshape(1, cout), (1, W))
    return pl.pallas_call(
        _bn_relu_kernel,
        out_shape=jax.ShapeDtypeStruct((N, H, wc), jnp.float32),
        grid=(nblk,),
        in_specs=[pl.BlockSpec((nt, H, wc), lambda i: (i, 0, 0)),
                  pl.BlockSpec((1, wc), lambda i: (0, 0)),
                  pl.BlockSpec((1, wc), lambda i: (0, 0))],
        out_specs=pl.BlockSpec((nt, H, wc), lambda i: (i, 0, 0)),
        compiler_params=pltpu.CompilerParams(
            dimension_semantics=("parallel",),
            vmem_limit_bytes=_vmem_limit_bytes()),
    )(y2d, sc_t, sh_t)


# ----------------------------------------------------------------------------
# Full conv_block forward (PyTorch NCHW in / NCHW out).
# ----------------------------------------------------------------------------
def conv_block_forward(x_nchw, params):
    x = jnp.transpose(x_nchw.astype(jnp.float32), (0, 2, 3, 1))   # NHWC
    N, H, W, Cin = x.shape
    Cout = params["w1"].shape[3]
    x2d = x.reshape(N, H, W * Cin)              # contiguous, lane-dense slab

    dummy = jnp.zeros((Cin,), jnp.float32)
    # Stage 1: conv1 + BN1 batch statistics.
    y1, m1, v1 = conv3x3_bn_stats(x2d, params["w1"], params["b1"],
                                  dummy, dummy, fuse_input_bnrelu=False)
    # Fold BN1 + ReLU into stage-2 conv's input load.
    scale1 = params["gamma1"].reshape(-1) * jax.lax.rsqrt(v1 + EPS)
    shift1 = params["beta1"].reshape(-1) - m1 * scale1
    # Stage 2: (BN1+ReLU -> conv2) + BN2 batch statistics.
    y2, m2, v2 = conv3x3_bn_stats(y1, params["w2"], params["b2"],
                                  scale1, shift1, fuse_input_bnrelu=True)
    # Epilogue: BN2 + ReLU (lane-dense elementwise, whole batch per step).
    out2d = bn_relu_epilogue(y2, m2, v2, params["gamma2"], params["beta2"],
                             cout=Cout)
    out = out2d.reshape(N, H, W, Cout)
    # TODO(synk): fold this NHWC->NCHW transpose into the epilogue kernel.
    return jnp.transpose(out, (0, 3, 1, 2))                       # NCHW


if __name__ == "__main__":
    key = jax.random.PRNGKey(0)
    kx, kw1, kw2, kb1, kb2 = jax.random.split(key, 5)
    N, Cin, Cout, H, W = 2, 4, 8, 16, 16

    x = jax.random.normal(kx, (N, Cin, H, W), jnp.float32)
    params = {
        "w1": 0.1 * jax.random.normal(kw1, (3, 3, Cin, Cout), jnp.float32),
        "b1": 0.1 * jax.random.normal(kb1, (Cout,), jnp.float32),
        "gamma1": jnp.ones((1, Cout), jnp.float32),
        "beta1": jnp.zeros((1, Cout), jnp.float32),
        "w2": 0.1 * jax.random.normal(kw2, (3, 3, Cout, Cout), jnp.float32),
        "b2": 0.1 * jax.random.normal(kb2, (Cout,), jnp.float32),
        "gamma2": jnp.ones((1, Cout), jnp.float32),
        "beta2": jnp.zeros((1, Cout), jnp.float32),
    }

    fwd = jax.jit(conv_block_forward)
    out = fwd(x, params)
    jax.block_until_ready(out)

    # Pure-JAX reference (training-mode BatchNorm uses batch statistics).
    # conv_dtype=f32 -> exact module semantics; conv_dtype=bf16 mirrors the
    # kernel's bf16 MXU operand rounding (f32 accumulation) for a tight check.
    def ref(x_nchw, conv_dtype):
        xh = jnp.transpose(x_nchw.astype(jnp.float32), (0, 2, 3, 1))

        def stage(xh, w, b, g, be):
            y = jax.lax.conv_general_dilated(
                xh.astype(conv_dtype), w.astype(conv_dtype), (1, 1), "SAME",
                dimension_numbers=("NHWC", "HWIO", "NHWC"),
                preferred_element_type=jnp.float32) + b
            m = jnp.mean(y, axis=(0, 1, 2))
            v = jnp.var(y, axis=(0, 1, 2))
            y = (y - m) * jax.lax.rsqrt(v + EPS) * g.reshape(-1) + be.reshape(-1)
            return jnp.maximum(y, 0.0)

        yh = stage(xh, params["w1"], params["b1"], params["gamma1"], params["beta1"])
        yh = stage(yh, params["w2"], params["b2"], params["gamma2"], params["beta2"])
        return jnp.transpose(yh, (0, 3, 1, 2))

    assert out.shape == (N, Cout, H, W)
    r32 = ref(x, jnp.float32)     # exact f32 module semantics
    rbf = ref(x, jnp.bfloat16)    # bf16-operand-matched reference
    err32 = float(jnp.max(jnp.abs(out - r32)))
    errbf = float(jnp.max(jnp.abs(out - rbf)))
    # Loose tolerance vs f32 (documents bf16-MXU rounding after two BN stages);
    # tight tolerance vs the bf16-operand-matched reference.
    assert jnp.allclose(out, r32, atol=3e-2, rtol=3e-2), err32
    assert jnp.allclose(out, rbf, atol=3e-3, rtol=3e-3), errbf
    print("KERNEL_OK")
</pallas_src>

<mosaic_0001>
module attributes {stable_mosaic.version = 11 : i64} {
  func.func @_fused_conv_kernel(%arg0: i32, %arg1: memref<2x16x64xf32, #tpu.memory_space<vmem>>, %arg2: memref<1x64xf32, #tpu.memory_space<vmem>>, %arg3: memref<1x64xf32, #tpu.memory_space<vmem>>, %arg4: memref<9x64x128xbf16, #tpu.memory_space<vmem>>, %arg5: memref<1x128xf32, #tpu.memory_space<vmem>>, %arg6: memref<2x16x128xf32, #tpu.memory_space<vmem>>, %arg7: memref<1x1x128xf32, #tpu.memory_space<vmem>>, %arg8: memref<1x1x128xf32, #tpu.memory_space<vmem>>, %arg9: memref<2x18x72xf32, #tpu.memory_space<vmem>>) attributes {dimension_semantics = [#tpu.dimension_semantics<parallel>], iteration_bounds = array<i64: 1>, scalar_prefetch = 0 : i64, scratch_operands = 1 : i64, tpu.core_type = #tpu.core_type<tc>, window_params = [{transform_indices = @transform_0, window_bounds = array<i64: 2, 16, 64>}, {pipeline_mode = #tpu.pipeline_mode<synchronous>, transform_indices = @transform_1, window_bounds = array<i64: 1, 64>}, {pipeline_mode = #tpu.pipeline_mode<synchronous>, transform_indices = @transform_2, window_bounds = array<i64: 1, 64>}, {pipeline_mode = #tpu.pipeline_mode<synchronous>, transform_indices = @transform_3, window_bounds = array<i64: 9, 64, 128>}, {pipeline_mode = #tpu.pipeline_mode<synchronous>, transform_indices = @transform_4, window_bounds = array<i64: 1, 128>}, {transform_indices = @transform_5, window_bounds = array<i64: 2, 16, 128>}, {transform_indices = @transform_6, window_bounds = array<i64: 1, 1, 128>}, {transform_indices = @transform_7, window_bounds = array<i64: 1, 1, 128>}]} {
    %c0 = arith.constant 0 : index
    %c0_0 = arith.constant 0 : index
    %c0_1 = arith.constant 0 : index
    %0 = vector.load %arg1[%c0, %c0_0, %c0_1] : memref<2x16x64xf32, #tpu.memory_space<vmem>>, vector<2x16x64xf32>
    %cst = arith.constant 0.000000e+00 : f32
    %1 = vector.broadcast %cst : f32 to vector<2x1x72xf32>
    %c0_2 = arith.constant 0 : index
    %c0_3 = arith.constant 0 : index
    %c0_4 = arith.constant 0 : index
    %2 = vector.load %arg9[%c0_2, %c0_3, %c0_4] : memref<2x18x72xf32, #tpu.memory_space<vmem>>, vector<2x1x72xf32>
    tpu.vector_store %arg9[%c0_2, %c0_3, %c0_4], %1 {strides = array<i32>} : memref<2x18x72xf32, #tpu.memory_space<vmem>>, vector<2x1x72xf32>,
    %cst_5 = arith.constant 0.000000e+00 : f32
    %3 = vector.broadcast %cst_5 : f32 to vector<2x1x72xf32>
    %c0_6 = arith.constant 0 : index
    %c17 = arith.constant 17 : index
    %c0_7 = arith.constant 0 : index
    %4 = vector.load %arg9[%c0_6, %c17, %c0_7] : memref<2x18x72xf32, #tpu.memory_space<vmem>>, vector<2x1x72xf32>
    tpu.vector_store %arg9[%c0_6, %c17, %c0_7], %3 {strides = array<i32>} : memref<2x18x72xf32, #tpu.memory_space<vmem>>, vector<2x1x72xf32>,
    %cst_8 = arith.constant 0.000000e+00 : f32
    %5 = vector.broadcast %cst_8 : f32 to vector<2x18x4xf32>
    %c0_9 = arith.constant 0 : index
    %c0_10 = arith.constant 0 : index
    %c0_11 = arith.constant 0 : index
    %6 = vector.load %arg9[%c0_9, %c0_10, %c0_11] : memref<2x18x72xf32, #tpu.memory_space<vmem>>, vector<2x18x4xf32>
    tpu.vector_store %arg9[%c0_9, %c0_10, %c0_11], %5 {strides = array<i32>} : memref<2x18x72xf32, #tpu.memory_space<vmem>>, vector<2x18x4xf32>,
    %cst_12 = arith.constant 0.000000e+00 : f32
    %7 = vector.broadcast %cst_12 : f32 to vector<2x18x4xf32>
    %c0_13 = arith.constant 0 : index
    %c0_14 = arith.constant 0 : index
    %c68 = arith.constant 68 : index
    %8 = vector.load %arg9[%c0_13, %c0_14, %c68] : memref<2x18x72xf32, #tpu.memory_space<vmem>>, vector<2x18x4xf32>
    tpu.vector_store %arg9[%c0_13, %c0_14, %c68], %7 {strides = array<i32>} : memref<2x18x72xf32, #tpu.memory_space<vmem>>, vector<2x18x4xf32>,
    %c0_15 = arith.constant 0 : index
    %c1 = arith.constant 1 : index
    %c4 = arith.constant 4 : index
    %9 = vector.load %arg9[%c0_15, %c1, %c4] : memref<2x18x72xf32, #tpu.memory_space<vmem>>, vector<2x16x64xf32>
    tpu.vector_store %arg9[%c0_15, %c1, %c4], %0 {strides = array<i32>} : memref<2x18x72xf32, #tpu.memory_space<vmem>>, vector<2x16x64xf32>,
    %c0_16 = arith.constant 0 : index
    %c0_17 = arith.constant 0 : index
    %c0_18 = arith.constant 0 : index
    %10 = vector.load %arg9[%c0_16, %c0_17, %c0_18] : memref<2x18x72xf32, #tpu.memory_space<vmem>>, vector<2x18x64xf32>
    %11 = arith.truncf %10 : vector<2x18x64xf32> to vector<2x18x64xbf16>
    %c0_19 = arith.constant 0 : index
    %c0_20 = arith.constant 0 : index
    %c4_21 = arith.constant 4 : index
    %12 = vector.load %arg9[%c0_19, %c0_20, %c4_21] : memref<2x18x72xf32, #tpu.memory_space<vmem>>, vector<2x18x64xf32>
    %13 = arith.truncf %12 : vector<2x18x64xf32> to vector<2x18x64xbf16>
    %c0_22 = arith.constant 0 : index
    %c0_23 = arith.constant 0 : index
    %c8 = arith.constant 8 : index
    %14 = vector.load %arg9[%c0_22, %c0_23, %c8] : memref<2x18x72xf32, #tpu.memory_space<vmem>>, vector<2x18x64xf32>
    %15 = arith.truncf %14 : vector<2x18x64xf32> to vector<2x18x64xbf16>
    %c0_24 = arith.constant 0 : index
    %c0_25 = arith.constant 0 : index
    %16 = vector.load %arg5[%c0_24, %c0_25] : memref<1x128xf32, #tpu.memory_space<vmem>>, vector<1x128xf32>
    %17 = vector.shape_cast %16 : vector<1x128xf32> to vector<1x128xf32>
    %18 = vector.broadcast %17 : vector<1x128xf32> to vector<32x128xf32>
    %19 = vector.extract_strided_slice %11 {offsets = [0, 0, 0], sizes = [2, 16, 64], strides = [1, 1, 1]} : vector<2x18x64xbf16> to vector<2x16x64xbf16>
    %20 = vector.shape_cast %19 : vector<2x16x64xbf16> to vector<32x64xbf16>
    %c0_26 = arith.constant 0 : index
    %c0_27 = arith.constant 0 : index
    %c0_28 = arith.constant 0 : index
    %21 = vector.load %arg4[%c0_26, %c0_27, %c0_28] : memref<9x64x128xbf16, #tpu.memory_space<vmem>>, vector<1x64x128xbf16>
    %22 = vector.shape_cast %21 : vector<1x64x128xbf16> to vector<64x128xbf16>
    %cst_29 = arith.constant dense<0.000000e+00> : vector<32x128xf32>
    %23 = tpu.matmul %20, %22, %cst_29 {dimension_numbers = #tpu.dot_dimension_numbers<[1], [0], [0], [1], [0, 0, 1, 1], [], []>} : vector<32x64xbf16>, vector<64x128xbf16>, vector<32x128xf32> -> vector<32x128xf32>
    %24 = arith.addf %18, %23 : vector<32x128xf32>
    %25 = vector.extract_strided_slice %13 {offsets = [0, 0, 0], sizes = [2, 16, 64], strides = [1, 1, 1]} : vector<2x18x64xbf16> to vector<2x16x64xbf16>
    %26 = vector.shape_cast %25 : vector<2x16x64xbf16> to vector<32x64xbf16>
    %c1_30 = arith.constant 1 : index
    %c0_31 = arith.constant 0 : index
    %c0_32 = arith.constant 0 : index
    %27 = vector.load %arg4[%c1_30, %c0_31, %c0_32] : memref<9x64x128xbf16, #tpu.memory_space<vmem>>, vector<1x64x128xbf16>
    %28 = vector.shape_cast %27 : vector<1x64x128xbf16> to vector<64x128xbf16>
    %cst_33 = arith.constant dense<0.000000e+00> : vector<32x128xf32>
    %29 = tpu.matmul %26, %28, %cst_33 {dimension_numbers = #tpu.dot_dimension_numbers<[1], [0], [0], [1], [0, 0, 1, 1], [], []>} : vector<32x64xbf16>, vector<64x128xbf16>, vector<32x128xf32> -> vector<32x128xf32>
    %30 = arith.addf %24, %29 : vector<32x128xf32>
    %31 = vector.extract_strided_slice %15 {offsets = [0, 0, 0], sizes = [2, 16, 64], strides = [1, 1, 1]} : vector<2x18x64xbf16> to vector<2x16x64xbf16>
    %32 = vector.shape_cast %31 : vector<2x16x64xbf16> to vector<32x64xbf16>
    %c2 = arith.constant 2 : index
    %c0_34 = arith.constant 0 : index
    %c0_35 = arith.constant 0 : index
    %33 = vector.load %arg4[%c2, %c0_34, %c0_35] : memref<9x64x128xbf16, #tpu.memory_space<vmem>>, vector<1x64x128xbf16>
    %34 = vector.shape_cast %33 : vector<1x64x128xbf16> to vector<64x128xbf16>
    %cst_36 = arith.constant dense<0.000000e+00> : vector<32x128xf32>
    %35 = tpu.matmul %32, %34, %cst_36 {dimension_numbers = #tpu.dot_dimension_numbers<[1], [0], [0], [1], [0, 0, 1, 1], [], []>} : vector<32x64xbf16>, vector<64x128xbf16>, vector<32x128xf32> -> vector<32x128xf32>
    %36 = arith.addf %30, %35 : vector<32x128xf32>
    %37 = vector.extract_strided_slice %11 {offsets = [0, 1, 0], sizes = [2, 16, 64], strides = [1, 1, 1]} : vector<2x18x64xbf16> to vector<2x16x64xbf16>
    %38 = vector.shape_cast %37 : vector<2x16x64xbf16> to vector<32x64xbf16>
    %c3 = arith.constant 3 : index
    %c0_37 = arith.constant 0 : index
    %c0_38 = arith.constant 0 : index
    %39 = vector.load %arg4[%c3, %c0_37, %c0_38] : memref<9x64x128xbf16, #tpu.memory_space<vmem>>, vector<1x64x128xbf16>
    %40 = vector.shape_cast %39 : vector<1x64x128xbf16> to vector<64x128xbf16>
    %cst_39 = arith.constant dense<0.000000e+00> : vector<32x128xf32>
    %41 = tpu.matmul %38, %40, %cst_39 {dimension_numbers = #tpu.dot_dimension_numbers<[1], [0], [0], [1], [0, 0, 1, 1], [], []>} : vector<32x64xbf16>, vector<64x128xbf16>, vector<32x128xf32> -> vector<32x128xf32>
    %42 = arith.addf %36, %41 : vector<32x128xf32>
    %43 = vector.extract_strided_slice %13 {offsets = [0, 1, 0], sizes = [2, 16, 64], strides = [1, 1, 1]} : vector<2x18x64xbf16> to vector<2x16x64xbf16>
    %44 = vector.shape_cast %43 : vector<2x16x64xbf16> to vector<32x64xbf16>
    %c4_40 = arith.constant 4 : index
    %c0_41 = arith.constant 0 : index
    %c0_42 = arith.constant 0 : index
    %45 = vector.load %arg4[%c4_40, %c0_41, %c0_42] : memref<9x64x128xbf16, #tpu.memory_space<vmem>>, vector<1x64x128xbf16>
    %46 = vector.shape_cast %45 : vector<1x64x128xbf16> to vector<64x128xbf16>
    %cst_43 = arith.constant dense<0.000000e+00> : vector<32x128xf32>
    %47 = tpu.matmul %44, %46, %cst_43 {dimension_numbers = #tpu.dot_dimension_numbers<[1], [0], [0], [1], [0, 0, 1, 1], [], []>} : vector<32x64xbf16>, vector<64x128xbf16>, vector<32x128xf32> -> vector<32x128xf32>
    %48 = arith.addf %42, %47 : vector<32x128xf32>
    %49 = vector.extract_strided_slice %15 {offsets = [0, 1, 0], sizes = [2, 16, 64], strides = [1, 1, 1]} : vector<2x18x64xbf16> to vector<2x16x64xbf16>
    %50 = vector.shape_cast %49 : vector<2x16x64xbf16> to vector<32x64xbf16>
    %c5 = arith.constant 5 : index
    %c0_44 = arith.constant 0 : index
    %c0_45 = arith.constant 0 : index
    %51 = vector.load %arg4[%c5, %c0_44, %c0_45] : memref<9x64x128xbf16, #tpu.memory_space<vmem>>, vector<1x64x128xbf16>
    %52 = vector.shape_cast %51 : vector<1x64x128xbf16> to vector<64x128xbf16>
    %cst_46 = arith.constant dense<0.000000e+00> : vector<32x128xf32>
    %53 = tpu.matmul %50, %52, %cst_46 {dimension_numbers = #tpu.dot_dimension_numbers<[1], [0], [0], [1], [0, 0, 1, 1], [], []>} : vector<32x64xbf16>, vector<64x128xbf16>, vector<32x128xf32> -> vector<32x128xf32>
    %54 = arith.addf %48, %53 : vector<32x128xf32>
    %55 = vector.extract_strided_slice %11 {offsets = [0, 2, 0], sizes = [2, 16, 64], strides = [1, 1, 1]} : vector<2x18x64xbf16> to vector<2x16x64xbf16>
    %56 = vector.shape_cast %55 : vector<2x16x64xbf16> to vector<32x64xbf16>
    %c6 = arith.constant 6 : index
    %c0_47 = arith.constant 0 : index
    %c0_48 = arith.constant 0 : index
    %57 = vector.load %arg4[%c6, %c0_47, %c0_48] : memref<9x64x128xbf16, #tpu.memory_space<vmem>>, vector<1x64x128xbf16>
    %58 = vector.shape_cast %57 : vector<1x64x128xbf16> to vector<64x128xbf16>
    %cst_49 = arith.constant dense<0.000000e+00> : vector<32x128xf32>
    %59 = tpu.matmul %56, %58, %cst_49 {dimension_numbers = #tpu.dot_dimension_numbers<[1], [0], [0], [1], [0, 0, 1, 1], [], []>} : vector<32x64xbf16>, vector<64x128xbf16>, vector<32x128xf32> -> vector<32x128xf32>
    %60 = arith.addf %54, %59 : vector<32x128xf32>
    %61 = vector.extract_strided_slice %13 {offsets = [0, 2, 0], sizes = [2, 16, 64], strides = [1, 1, 1]} : vector<2x18x64xbf16> to vector<2x16x64xbf16>
    %62 = vector.shape_cast %61 : vector<2x16x64xbf16> to vector<32x64xbf16>
    %c7 = arith.constant 7 : index
    %c0_50 = arith.constant 0 : index
    %c0_51 = arith.constant 0 : index
    %63 = vector.load %arg4[%c7, %c0_50, %c0_51] : memref<9x64x128xbf16, #tpu.memory_space<vmem>>, vector<1x64x128xbf16>
    %64 = vector.shape_cast %63 : vector<1x64x128xbf16> to vector<64x128xbf16>
    %cst_52 = arith.constant dense<0.000000e+00> : vector<32x128xf32>
    %65 = tpu.matmul %62, %64, %cst_52 {dimension_numbers = #tpu.dot_dimension_numbers<[1], [0], [0], [1], [0, 0, 1, 1], [], []>} : vector<32x64xbf16>, vector<64x128xbf16>, vector<32x128xf32> -> vector<32x128xf32>
    %66 = arith.addf %60, %65 : vector<32x128xf32>
    %67 = vector.extract_strided_slice %15 {offsets = [0, 2, 0], sizes = [2, 16, 64], strides = [1, 1, 1]} : vector<2x18x64xbf16> to vector<2x16x64xbf16>
    %68 = vector.shape_cast %67 : vector<2x16x64xbf16> to vector<32x64xbf16>
    %c8_53 = arith.constant 8 : index
    %c0_54 = arith.constant 0 : index
    %c0_55 = arith.constant 0 : index
    %69 = vector.load %arg4[%c8_53, %c0_54, %c0_55] : memref<9x64x128xbf16, #tpu.memory_space<vmem>>, vector<1x64x128xbf16>
    %70 = vector.shape_cast %69 : vector<1x64x128xbf16> to vector<64x128xbf16>
    %cst_56 = arith.constant dense<0.000000e+00> : vector<32x128xf32>
    %71 = tpu.matmul %68, %70, %cst_56 {dimension_numbers = #tpu.dot_dimension_numbers<[1], [0], [0], [1], [0, 0, 1, 1], [], []>} : vector<32x64xbf16>, vector<64x128xbf16>, vector<32x128xf32> -> vector<32x128xf32>
    %72 = arith.addf %66, %71 : vector<32x128xf32>
    %73 = vector.shape_cast %72 : vector<32x128xf32> to vector<2x16x128xf32>
    %c0_57 = arith.constant 0 : index
    %c0_58 = arith.constant 0 : index
    %c0_59 = arith.constant 0 : index
    %74 = vector.load %arg6[%c0_57, %c0_58, %c0_59] : memref<2x16x128xf32, #tpu.memory_space<vmem>>, vector<2x16x128xf32>
    tpu.vector_store %arg6[%c0_57, %c0_58, %c0_59], %73 {strides = array<i32>} : memref<2x16x128xf32, #tpu.memory_space<vmem>>, vector<2x16x128xf32>,
    %cst_60 = arith.constant dense<0.000000e+00> : vector<128xf32>
    %75 = vector.multi_reduction <add>, %72, %cst_60 [0] : vector<32x128xf32> to vector<128xf32>
    %76 = vector.shape_cast %75 : vector<128xf32> to vector<1x128xf32>
    %77 = vector.shape_cast %76 : vector<1x128xf32> to vector<1x1x128xf32>
    %c0_61 = arith.constant 0 : index
    %c0_62 = arith.constant 0 : index
    %c0_63 = arith.constant 0 : index
    %78 = vector.load %arg7[%c0_61, %c0_62, %c0_63] : memref<1x1x128xf32, #tpu.memory_space<vmem>>, vector<1x1x128xf32>
    tpu.vector_store %arg7[%c0_61, %c0_62, %c0_63], %77 {strides = array<i32>} : memref<1x1x128xf32, #tpu.memory_space<vmem>>, vector<1x1x128xf32>,
    %79 = arith.mulf %72, %72 : vector<32x128xf32>
    %cst_64 = arith.constant dense<0.000000e+00> : vector<128xf32>
    %80 = vector.multi_reduction <add>, %79, %cst_64 [0] : vector<32x128xf32> to vector<128xf32>
    %81 = vector.shape_cast %80 : vector<128xf32> to vector<1x128xf32>
    %82 = vector.shape_cast %81 : vector<1x128xf32> to vector<1x1x128xf32>
    %c0_65 = arith.constant 0 : index
    %c0_66 = arith.constant 0 : index
    %c0_67 = arith.constant 0 : index
    %83 = vector.load %arg8[%c0_65, %c0_66, %c0_67] : memref<1x1x128xf32, #tpu.memory_space<vmem>>, vector<1x1x128xf32>
    tpu.vector_store %arg8[%c0_65, %c0_66, %c0_67], %82 {strides = array<i32>} : memref<1x1x128xf32, #tpu.memory_space<vmem>>, vector<1x1x128xf32>,
    return
  }
  func.func @transform_0(%arg0: i32) -> (i32, i32, i32) {
    %c0_i32 = arith.constant 0 : i32
    %c0_i32_0 = arith.constant 0 : i32
    %c0_i32_1 = arith.constant 0 : i32
    return %arg0, %c0_i32, %c0_i32_0 : i32, i32, i32
  }
  func.func @transform_1(%arg0: i32) -> (i32, i32) {
    %c0_i32 = arith.constant 0 : i32
    %c0_i32_0 = arith.constant 0 : i32
    %c0_i32_1 = arith.constant 0 : i32
    return %c0_i32, %c0_i32_0 : i32, i32
  }
  func.func @transform_2(%arg0: i32) -> (i32, i32) {
    %c0_i32 = arith.constant 0 : i32
    %c0_i32_0 = arith.constant 0 : i32
    %c0_i32_1 = arith.constant 0 : i32
    return %c0_i32, %c0_i32_0 : i32, i32
  }
  func.func @transform_3(%arg0: i32) -> (i32, i32, i32) {
    %c0_i32 = arith.constant 0 : i32
    %c0_i32_0 = arith.constant 0 : i32
    %c0_i32_1 = arith.constant 0 : i32
    %c0_i32_2 = arith.constant 0 : i32
    return %c0_i32, %c0_i32_0, %c0_i32_1 : i32, i32, i32
  }
  func.func @transform_4(%arg0: i32) -> (i32, i32) {
    %c0_i32 = arith.constant 0 : i32
    %c0_i32_0 = arith.constant 0 : i32
    %c0_i32_1 = arith.constant 0 : i32
    return %c0_i32, %c0_i32_0 : i32, i32
  }
  func.func @transform_5(%arg0: i32) -> (i32, i32, i32) {
    %c0_i32 = arith.constant 0 : i32
    %c0_i32_0 = arith.constant 0 : i32
    %c0_i32_1 = arith.constant 0 : i32
    return %arg0, %c0_i32, %c0_i32_0 : i32, i32, i32
  }
  func.func @transform_6(%arg0: i32) -> (i32, i32, i32) {
    %c0_i32 = arith.constant 0 : i32
    %c0_i32_0 = arith.constant 0 : i32
    %c0_i32_1 = arith.constant 0 : i32
    return %arg0, %c0_i32, %c0_i32_0 : i32, i32, i32
  }
  func.func @transform_7(%arg0: i32) -> (i32, i32, i32) {
    %c0_i32 = arith.constant 0 : i32
    %c0_i32_0 = arith.constant 0 : i32
    %c0_i32_1 = arith.constant 0 : i32
    return %arg0, %c0_i32, %c0_i32_0 : i32, i32, i32
  }
}

module attributes {stable_mosaic.version = 11 : i64} {
  func.func @_fused_conv_kernel(%arg0: i32, %arg1: memref<2x16x128xf32, #tpu.memory_space<vmem>>, %arg2: memref<1x128xf32, #tpu.memory_space<vmem>>, %arg3: memref<1x128xf32, #tpu.memory_space<vmem>>, %arg4: memref<9x128x128xbf16, #tpu.memory_space<vmem>>, %arg5: memref<1x128xf32, #tpu.memory_space<vmem>>, %arg6: memref<2x16x128xf32, #tpu.memory_space<vmem>>, %arg7: memref<1x1x128xf32, #tpu.memory_space<vmem>>, %arg8: memref<1x1x128xf32, #tpu.memory_space<vmem>>, %arg9: memref<2x18x144xf32, #tpu.memory_space<vmem>>) attributes {dimension_semantics = [#tpu.dimension_semantics<parallel>], iteration_bounds = array<i64: 1>, scalar_prefetch = 0 : i64, scratch_operands = 1 : i64, tpu.core_type = #tpu.core_type<tc>, window_params = [{transform_indices = @transform_0, window_bounds = array<i64: 2, 16, 128>}, {pipeline_mode = #tpu.pipeline_mode<synchronous>, transform_indices = @transform_1, window_bounds = array<i64: 1, 128>}, {pipeline_mode = #tpu.pipeline_mode<synchronous>, transform_indices = @transform_2, window_bounds = array<i64: 1, 128>}, {pipeline_mode = #tpu.pipeline_mode<synchronous>, transform_indices = @transform_3, window_bounds = array<i64: 9, 128, 128>}, {pipeline_mode = #tpu.pipeline_mode<synchronous>, transform_indices = @transform_4, window_bounds = array<i64: 1, 128>}, {transform_indices = @transform_5, window_bounds = array<i64: 2, 16, 128>}, {transform_indices = @transform_6, window_bounds = array<i64: 1, 1, 128>}, {transform_indices = @transform_7, window_bounds = array<i64: 1, 1, 128>}]} {
    %c0 = arith.constant 0 : index
    %c0_0 = arith.constant 0 : index
    %c0_1 = arith.constant 0 : index
    %0 = vector.load %arg1[%c0, %c0_0, %c0_1] : memref<2x16x128xf32, #tpu.memory_space<vmem>>, vector<2x16x128xf32>
    %c0_2 = arith.constant 0 : index
    %c0_3 = arith.constant 0 : index
    %1 = vector.load %arg2[%c0_2, %c0_3] : memref<1x128xf32, #tpu.memory_space<vmem>>, vector<1x128xf32>
    %2 = vector.shape_cast %1 : vector<1x128xf32> to vector<1x1x128xf32>
    %3 = vector.broadcast %2 : vector<1x1x128xf32> to vector<2x16x128xf32>
    %4 = arith.mulf %0, %3 : vector<2x16x128xf32>
    %c0_4 = arith.constant 0 : index
    %c0_5 = arith.constant 0 : index
    %5 = vector.load %arg3[%c0_4, %c0_5] : memref<1x128xf32, #tpu.memory_space<vmem>>, vector<1x128xf32>
    %6 = vector.shape_cast %5 : vector<1x128xf32> to vector<1x1x128xf32>
    %7 = vector.broadcast %6 : vector<1x1x128xf32> to vector<2x16x128xf32>
    %8 = arith.addf %4, %7 : vector<2x16x128xf32>
    %cst = arith.constant 0.000000e+00 : f32
    %9 = vector.broadcast %cst : f32 to vector<2x16x128xf32>
    %10 = arith.maximumf %8, %9 : vector<2x16x128xf32>
    %cst_6 = arith.constant 0.000000e+00 : f32
    %11 = vector.broadcast %cst_6 : f32 to vector<2x1x144xf32>
    %c0_7 = arith.constant 0 : index
    %c0_8 = arith.constant 0 : index
    %c0_9 = arith.constant 0 : index
    %12 = vector.load %arg9[%c0_7, %c0_8, %c0_9] : memref<2x18x144xf32, #tpu.memory_space<vmem>>, vector<2x1x144xf32>
    tpu.vector_store %arg9[%c0_7, %c0_8, %c0_9], %11 {strides = array<i32>} : memref<2x18x144xf32, #tpu.memory_space<vmem>>, vector<2x1x144xf32>,
    %cst_10 = arith.constant 0.000000e+00 : f32
    %13 = vector.broadcast %cst_10 : f32 to vector<2x1x144xf32>
    %c0_11 = arith.constant 0 : index
    %c17 = arith.constant 17 : index
    %c0_12 = arith.constant 0 : index
    %14 = vector.load %arg9[%c0_11, %c17, %c0_12] : memref<2x18x144xf32, #tpu.memory_space<vmem>>, vector<2x1x144xf32>
    tpu.vector_store %arg9[%c0_11, %c17, %c0_12], %13 {strides = array<i32>} : memref<2x18x144xf32, #tpu.memory_space<vmem>>, vector<2x1x144xf32>,
    %cst_13 = arith.constant 0.000000e+00 : f32
    %15 = vector.broadcast %cst_13 : f32 to vector<2x18x8xf32>
    %c0_14 = arith.constant 0 : index
    %c0_15 = arith.constant 0 : index
    %c0_16 = arith.constant 0 : index
    %16 = vector.load %arg9[%c0_14, %c0_15, %c0_16] : memref<2x18x144xf32, #tpu.memory_space<vmem>>, vector<2x18x8xf32>
    tpu.vector_store %arg9[%c0_14, %c0_15, %c0_16], %15 {strides = array<i32>} : memref<2x18x144xf32, #tpu.memory_space<vmem>>, vector<2x18x8xf32>,
    %cst_17 = arith.constant 0.000000e+00 : f32
    %17 = vector.broadcast %cst_17 : f32 to vector<2x18x8xf32>
    %c0_18 = arith.constant 0 : index
    %c0_19 = arith.constant 0 : index
    %c136 = arith.constant 136 : index
    %18 = vector.load %arg9[%c0_18, %c0_19, %c136] : memref<2x18x144xf32, #tpu.memory_space<vmem>>, vector<2x18x8xf32>
    tpu.vector_store %arg9[%c0_18, %c0_19, %c136], %17 {strides = array<i32>} : memref<2x18x144xf32, #tpu.memory_space<vmem>>, vector<2x18x8xf32>,
    %c0_20 = arith.constant 0 : index
    %c1 = arith.constant 1 : index
    %c8 = arith.constant 8 : index
    %19 = vector.load %arg9[%c0_20, %c1, %c8] : memref<2x18x144xf32, #tpu.memory_space<vmem>>, vector<2x16x128xf32>
    tpu.vector_store %arg9[%c0_20, %c1, %c8], %10 {strides = array<i32>} : memref<2x18x144xf32, #tpu.memory_space<vmem>>, vector<2x16x128xf32>,
    %c0_21 = arith.constant 0 : index
    %c0_22 = arith.constant 0 : index
    %c0_23 = arith.constant 0 : index
    %20 = vector.load %arg9[%c0_21, %c0_22, %c0_23] : memref<2x18x144xf32, #tpu.memory_space<vmem>>, vector<2x18x128xf32>
    %21 = arith.truncf %20 : vector<2x18x128xf32> to vector<2x18x128xbf16>
    %c0_24 = arith.constant 0 : index
    %c0_25 = arith.constant 0 : index
    %c8_26 = arith.constant 8 : index
    %22 = vector.load %arg9[%c0_24, %c0_25, %c8_26] : memref<2x18x144xf32, #tpu.memory_space<vmem>>, vector<2x18x128xf32>
    %23 = arith.truncf %22 : vector<2x18x128xf32> to vector<2x18x128xbf16>
    %c0_27 = arith.constant 0 : index
    %c0_28 = arith.constant 0 : index
    %c16 = arith.constant 16 : index
    %24 = vector.load %arg9[%c0_27, %c0_28, %c16] : memref<2x18x144xf32, #tpu.memory_space<vmem>>, vector<2x18x128xf32>
    %25 = arith.truncf %24 : vector<2x18x128xf32> to vector<2x18x128xbf16>
    %c0_29 = arith.constant 0 : index
    %c0_30 = arith.constant 0 : index
    %26 = vector.load %arg5[%c0_29, %c0_30] : memref<1x128xf32, #tpu.memory_space<vmem>>, vector<1x128xf32>
    %27 = vector.shape_cast %26 : vector<1x128xf32> to vector<1x128xf32>
    %28 = vector.broadcast %27 : vector<1x128xf32> to vector<32x128xf32>
    %29 = vector.extract_strided_slice %21 {offsets = [0, 0, 0], sizes = [2, 16, 128], strides = [1, 1, 1]} : vector<2x18x128xbf16> to vector<2x16x128xbf16>
    %30 = vector.shape_cast %29 : vector<2x16x128xbf16> to vector<32x128xbf16>
    %c0_31 = arith.constant 0 : index
    %c0_32 = arith.constant 0 : index
    %c0_33 = arith.constant 0 : index
    %31 = vector.load %arg4[%c0_31, %c0_32, %c0_33] : memref<9x128x128xbf16, #tpu.memory_space<vmem>>, vector<1x128x128xbf16>
    %32 = vector.shape_cast %31 : vector<1x128x128xbf16> to vector<128x128xbf16>
    %cst_34 = arith.constant dense<0.000000e+00> : vector<32x128xf32>
    %33 = tpu.matmul %30, %32, %cst_34 {dimension_numbers = #tpu.dot_dimension_numbers<[1], [0], [0], [1], [0, 0, 1, 1], [], []>} : vector<32x128xbf16>, vector<128x128xbf16>, vector<32x128xf32> -> vector<32x128xf32>
    %34 = arith.addf %28, %33 : vector<32x128xf32>
    %35 = vector.extract_strided_slice %23 {offsets = [0, 0, 0], sizes = [2, 16, 128], strides = [1, 1, 1]} : vector<2x18x128xbf16> to vector<2x16x128xbf16>
    %36 = vector.shape_cast %35 : vector<2x16x128xbf16> to vector<32x128xbf16>
    %c1_35 = arith.constant 1 : index
    %c0_36 = arith.constant 0 : index
    %c0_37 = arith.constant 0 : index
    %37 = vector.load %arg4[%c1_35, %c0_36, %c0_37] : memref<9x128x128xbf16, #tpu.memory_space<vmem>>, vector<1x128x128xbf16>
    %38 = vector.shape_cast %37 : vector<1x128x128xbf16> to vector<128x128xbf16>
    %cst_38 = arith.constant dense<0.000000e+00> : vector<32x128xf32>
    %39 = tpu.matmul %36, %38, %cst_38 {dimension_numbers = #tpu.dot_dimension_numbers<[1], [0], [0], [1], [0, 0, 1, 1], [], []>} : vector<32x128xbf16>, vector<128x128xbf16>, vector<32x128xf32> -> vector<32x128xf32>
    %40 = arith.addf %34, %39 : vector<32x128xf32>
    %41 = vector.extract_strided_slice %25 {offsets = [0, 0, 0], sizes = [2, 16, 128], strides = [1, 1, 1]} : vector<2x18x128xbf16> to vector<2x16x128xbf16>
    %42 = vector.shape_cast %41 : vector<2x16x128xbf16> to vector<32x128xbf16>
    %c2 = arith.constant 2 : index
    %c0_39 = arith.constant 0 : index
    %c0_40 = arith.constant 0 : index
    %43 = vector.load %arg4[%c2, %c0_39, %c0_40] : memref<9x128x128xbf16, #tpu.memory_space<vmem>>, vector<1x128x128xbf16>
    %44 = vector.shape_cast %43 : vector<1x128x128xbf16> to vector<128x128xbf16>
    %cst_41 = arith.constant dense<0.000000e+00> : vector<32x128xf32>
    %45 = tpu.matmul %42, %44, %cst_41 {dimension_numbers = #tpu.dot_dimension_numbers<[1], [0], [0], [1], [0, 0, 1, 1], [], []>} : vector<32x128xbf16>, vector<128x128xbf16>, vector<32x128xf32> -> vector<32x128xf32>
    %46 = arith.addf %40, %45 : vector<32x128xf32>
    %47 = vector.extract_strided_slice %21 {offsets = [0, 1, 0], sizes = [2, 16, 128], strides = [1, 1, 1]} : vector<2x18x128xbf16> to vector<2x16x128xbf16>
    %48 = vector.shape_cast %47 : vector<2x16x128xbf16> to vector<32x128xbf16>
    %c3 = arith.constant 3 : index
    %c0_42 = arith.constant 0 : index
    %c0_43 = arith.constant 0 : index
    %49 = vector.load %arg4[%c3, %c0_42, %c0_43] : memref<9x128x128xbf16, #tpu.memory_space<vmem>>, vector<1x128x128xbf16>
    %50 = vector.shape_cast %49 : vector<1x128x128xbf16> to vector<128x128xbf16>
    %cst_44 = arith.constant dense<0.000000e+00> : vector<32x128xf32>
    %51 = tpu.matmul %48, %50, %cst_44 {dimension_numbers = #tpu.dot_dimension_numbers<[1], [0], [0], [1], [0, 0, 1, 1], [], []>} : vector<32x128xbf16>, vector<128x128xbf16>, vector<32x128xf32> -> vector<32x128xf32>
    %52 = arith.addf %46, %51 : vector<32x128xf32>
    %53 = vector.extract_strided_slice %23 {offsets = [0, 1, 0], sizes = [2, 16, 128], strides = [1, 1, 1]} : vector<2x18x128xbf16> to vector<2x16x128xbf16>
    %54 = vector.shape_cast %53 : vector<2x16x128xbf16> to vector<32x128xbf16>
    %c4 = arith.constant 4 : index
    %c0_45 = arith.constant 0 : index
    %c0_46 = arith.constant 0 : index
    %55 = vector.load %arg4[%c4, %c0_45, %c0_46] : memref<9x128x128xbf16, #tpu.memory_space<vmem>>, vector<1x128x128xbf16>
    %56 = vector.shape_cast %55 : vector<1x128x128xbf16> to vector<128x128xbf16>
    %cst_47 = arith.constant dense<0.000000e+00> : vector<32x128xf32>
    %57 = tpu.matmul %54, %56, %cst_47 {dimension_numbers = #tpu.dot_dimension_numbers<[1], [0], [0], [1], [0, 0, 1, 1], [], []>} : vector<32x128xbf16>, vector<128x128xbf16>, vector<32x128xf32> -> vector<32x128xf32>
    %58 = arith.addf %52, %57 : vector<32x128xf32>
    %59 = vector.extract_strided_slice %25 {offsets = [0, 1, 0], sizes = [2, 16, 128], strides = [1, 1, 1]} : vector<2x18x128xbf16> to vector<2x16x128xbf16>
    %60 = vector.shape_cast %59 : vector<2x16x128xbf16> to vector<32x128xbf16>
    %c5 = arith.constant 5 : index
    %c0_48 = arith.constant 0 : index
    %c0_49 = arith.constant 0 : index
    %61 = vector.load %arg4[%c5, %c0_48, %c0_49] : memref<9x128x128xbf16, #tpu.memory_space<vmem>>, vector<1x128x128xbf16>
    %62 = vector.shape_cast %61 : vector<1x128x128xbf16> to vector<128x128xbf16>
    %cst_50 = arith.constant dense<0.000000e+00> : vector<32x128xf32>
    %63 = tpu.matmul %60, %62, %cst_50 {dimension_numbers = #tpu.dot_dimension_numbers<[1], [0], [0], [1], [0, 0, 1, 1], [], []>} : vector<32x128xbf16>, vector<128x128xbf16>, vector<32x128xf32> -> vector<32x128xf32>
    %64 = arith.addf %58, %63 : vector<32x128xf32>
    %65 = vector.extract_strided_slice %21 {offsets = [0, 2, 0], sizes = [2, 16, 128], strides = [1, 1, 1]} : vector<2x18x128xbf16> to vector<2x16x128xbf16>
    %66 = vector.shape_cast %65 : vector<2x16x128xbf16> to vector<32x128xbf16>
    %c6 = arith.constant 6 : index
    %c0_51 = arith.constant 0 : index
    %c0_52 = arith.constant 0 : index
    %67 = vector.load %arg4[%c6, %c0_51, %c0_52] : memref<9x128x128xbf16, #tpu.memory_space<vmem>>, vector<1x128x128xbf16>
    %68 = vector.shape_cast %67 : vector<1x128x128xbf16> to vector<128x128xbf16>
    %cst_53 = arith.constant dense<0.000000e+00> : vector<32x128xf32>
    %69 = tpu.matmul %66, %68, %cst_53 {dimension_numbers = #tpu.dot_dimension_numbers<[1], [0], [0], [1], [0, 0, 1, 1], [], []>} : vector<32x128xbf16>, vector<128x128xbf16>, vector<32x128xf32> -> vector<32x128xf32>
    %70 = arith.addf %64, %69 : vector<32x128xf32>
    %71 = vector.extract_strided_slice %23 {offsets = [0, 2, 0], sizes = [2, 16, 128], strides = [1, 1, 1]} : vector<2x18x128xbf16> to vector<2x16x128xbf16>
    %72 = vector.shape_cast %71 : vector<2x16x128xbf16> to vector<32x128xbf16>
    %c7 = arith.constant 7 : index
    %c0_54 = arith.constant 0 : index
    %c0_55 = arith.constant 0 : index
    %73 = vector.load %arg4[%c7, %c0_54, %c0_55] : memref<9x128x128xbf16, #tpu.memory_space<vmem>>, vector<1x128x128xbf16>
    %74 = vector.shape_cast %73 : vector<1x128x128xbf16> to vector<128x128xbf16>
    %cst_56 = arith.constant dense<0.000000e+00> : vector<32x128xf32>
    %75 = tpu.matmul %72, %74, %cst_56 {dimension_numbers = #tpu.dot_dimension_numbers<[1], [0], [0], [1], [0, 0, 1, 1], [], []>} : vector<32x128xbf16>, vector<128x128xbf16>, vector<32x128xf32> -> vector<32x128xf32>
    %76 = arith.addf %70, %75 : vector<32x128xf32>
    %77 = vector.extract_strided_slice %25 {offsets = [0, 2, 0], sizes = [2, 16, 128], strides = [1, 1, 1]} : vector<2x18x128xbf16> to vector<2x16x128xbf16>
    %78 = vector.shape_cast %77 : vector<2x16x128xbf16> to vector<32x128xbf16>
    %c8_57 = arith.constant 8 : index
    %c0_58 = arith.constant 0 : index
    %c0_59 = arith.constant 0 : index
    %79 = vector.load %arg4[%c8_57, %c0_58, %c0_59] : memref<9x128x128xbf16, #tpu.memory_space<vmem>>, vector<1x128x128xbf16>
    %80 = vector.shape_cast %79 : vector<1x128x128xbf16> to vector<128x128xbf16>
    %cst_60 = arith.constant dense<0.000000e+00> : vector<32x128xf32>
    %81 = tpu.matmul %78, %80, %cst_60 {dimension_numbers = #tpu.dot_dimension_numbers<[1], [0], [0], [1], [0, 0, 1, 1], [], []>} : vector<32x128xbf16>, vector<128x128xbf16>, vector<32x128xf32> -> vector<32x128xf32>
    %82 = arith.addf %76, %81 : vector<32x128xf32>
    %83 = vector.shape_cast %82 : vector<32x128xf32> to vector<2x16x128xf32>
    %c0_61 = arith.constant 0 : index
    %c0_62 = arith.constant 0 : index
    %c0_63 = arith.constant 0 : index
    %84 = vector.load %arg6[%c0_61, %c0_62, %c0_63] : memref<2x16x128xf32, #tpu.memory_space<vmem>>, vector<2x16x128xf32>
    tpu.vector_store %arg6[%c0_61, %c0_62, %c0_63], %83 {strides = array<i32>} : memref<2x16x128xf32, #tpu.memory_space<vmem>>, vector<2x16x128xf32>,
    %cst_64 = arith.constant dense<0.000000e+00> : vector<128xf32>
    %85 = vector.multi_reduction <add>, %82, %cst_64 [0] : vector<32x128xf32> to vector<128xf32>
    %86 = vector.shape_cast %85 : vector<128xf32> to vector<1x128xf32>
    %87 = vector.shape_cast %86 : vector<1x128xf32> to vector<1x1x128xf32>
    %c0_65 = arith.constant 0 : index
    %c0_66 = arith.constant 0 : index
    %c0_67 = arith.constant 0 : index
    %88 = vector.load %arg7[%c0_65, %c0_66, %c0_67] : memref<1x1x128xf32, #tpu.memory_space<vmem>>, vector<1x1x128xf32>
    tpu.vector_store %arg7[%c0_65, %c0_66, %c0_67], %87 {strides = array<i32>} : memref<1x1x128xf32, #tpu.memory_space<vmem>>, vector<1x1x128xf32>,
    %89 = arith.mulf %82, %82 : vector<32x128xf32>
    %cst_68 = arith.constant dense<0.000000e+00> : vector<128xf32>
    %90 = vector.multi_reduction <add>, %89, %cst_68 [0] : vector<32x128xf32> to vector<128xf32>
    %91 = vector.shape_cast %90 : vector<128xf32> to vector<1x128xf32>
    %92 = vector.shape_cast %91 : vector<1x128xf32> to vector<1x1x128xf32>
    %c0_69 = arith.constant 0 : index
    %c0_70 = arith.constant 0 : index
    %c0_71 = arith.constant 0 : index
    %93 = vector.load %arg8[%c0_69, %c0_70, %c0_71] : memref<1x1x128xf32, #tpu.memory_space<vmem>>, vector<1x1x128xf32>
    tpu.vector_store %arg8[%c0_69, %c0_70, %c0_71], %92 {strides = array<i32>} : memref<1x1x128xf32, #tpu.memory_space<vmem>>, vector<1x1x128xf32>,
    return
  }
  func.func @transform_0(%arg0: i32) -> (i32, i32, i32) {
    %c0_i32 = arith.constant 0 : i32
    %c0_i32_0 = arith.constant 0 : i32
    %c0_i32_1 = arith.constant 0 : i32
    return %arg0, %c0_i32, %c0_i32_0 : i32, i32, i32
  }
  func.func @transform_1(%arg0: i32) -> (i32, i32) {
    %c0_i32 = arith.constant 0 : i32
    %c0_i32_0 = arith.constant 0 : i32
    %c0_i32_1 = arith.constant 0 : i32
    return %c0_i32, %c0_i32_0 : i32, i32
  }
  func.func @transform_2(%arg0: i32) -> (i32, i32) {
    %c0_i32 = arith.constant 0 : i32
    %c0_i32_0 = arith.constant 0 : i32
    %c0_i32_1 = arith.constant 0 : i32
    return %c0_i32, %c0_i32_0 : i32, i32
  }
  func.func @transform_3(%arg0: i32) -> (i32, i32, i32) {
    %c0_i32 = arith.constant 0 : i32
    %c0_i32_0 = arith.constant 0 : i32
    %c0_i32_1 = arith.constant 0 : i32
    %c0_i32_2 = arith.constant 0 : i32
    return %c0_i32, %c0_i32_0, %c0_i32_1 : i32, i32, i32
  }
  func.func @transform_4(%arg0: i32) -> (i32, i32) {
    %c0_i32 = arith.constant 0 : i32
    %c0_i32_0 = arith.constant 0 : i32
    %c0_i32_1 = arith.constant 0 : i32
    return %c0_i32, %c0_i32_0 : i32, i32
  }
  func.func @transform_5(%arg0: i32) -> (i32, i32, i32) {
    %c0_i32 = arith.constant 0 : i32
    %c0_i32_0 = arith.constant 0 : i32
    %c0_i32_1 = arith.constant 0 : i32
    return %arg0, %c0_i32, %c0_i32_0 : i32, i32, i32
  }
  func.func @transform_6(%arg0: i32) -> (i32, i32, i32) {
    %c0_i32 = arith.constant 0 : i32
    %c0_i32_0 = arith.constant 0 : i32
    %c0_i32_1 = arith.constant 0 : i32
    return %arg0, %c0_i32, %c0_i32_0 : i32, i32, i32
  }
  func.func @transform_7(%arg0: i32) -> (i32, i32, i32) {
    %c0_i32 = arith.constant 0 : i32
    %c0_i32_0 = arith.constant 0 : i32
    %c0_i32_1 = arith.constant 0 : i32
    return %arg0, %c0_i32, %c0_i32_0 : i32, i32, i32
  }
}

module attributes {stable_mosaic.version = 11 : i64} {
  func.func @_bn_relu_kernel(%arg0: i32, %arg1: memref<2x16x128xf32, #tpu.memory_space<vmem>>, %arg2: memref<1x128xf32, #tpu.memory_space<vmem>>, %arg3: memref<1x128xf32, #tpu.memory_space<vmem>>, %arg4: memref<2x16x128xf32, #tpu.memory_space<vmem>>) attributes {dimension_semantics = [#tpu.dimension_semantics<parallel>], iteration_bounds = array<i64: 1>, scalar_prefetch = 0 : i64, scratch_operands = 0 : i64, tpu.core_type = #tpu.core_type<tc>, window_params = [{transform_indices = @transform_0, window_bounds = array<i64: 2, 16, 128>}, {pipeline_mode = #tpu.pipeline_mode<synchronous>, transform_indices = @transform_1, window_bounds = array<i64: 1, 128>}, {pipeline_mode = #tpu.pipeline_mode<synchronous>, transform_indices = @transform_2, window_bounds = array<i64: 1, 128>}, {transform_indices = @transform_3, window_bounds = array<i64: 2, 16, 128>}]} {
    %c0 = arith.constant 0 : index
    %c0_0 = arith.constant 0 : index
    %c0_1 = arith.constant 0 : index
    %0 = vector.load %arg1[%c0, %c0_0, %c0_1] : memref<2x16x128xf32, #tpu.memory_space<vmem>>, vector<2x16x128xf32>
    %c0_2 = arith.constant 0 : index
    %c0_3 = arith.constant 0 : index
    %1 = vector.load %arg2[%c0_2, %c0_3] : memref<1x128xf32, #tpu.memory_space<vmem>>, vector<1x128xf32>
    %2 = vector.shape_cast %1 : vector<1x128xf32> to vector<1x1x128xf32>
    %3 = vector.broadcast %2 : vector<1x1x128xf32> to vector<2x16x128xf32>
    %4 = arith.mulf %0, %3 : vector<2x16x128xf32>
    %c0_4 = arith.constant 0 : index
    %c0_5 = arith.constant 0 : index
    %5 = vector.load %arg3[%c0_4, %c0_5] : memref<1x128xf32, #tpu.memory_space<vmem>>, vector<1x128xf32>
    %6 = vector.shape_cast %5 : vector<1x128xf32> to vector<1x1x128xf32>
    %7 = vector.broadcast %6 : vector<1x1x128xf32> to vector<2x16x128xf32>
    %8 = arith.addf %4, %7 : vector<2x16x128xf32>
    %cst = arith.constant 0.000000e+00 : f32
    %9 = vector.broadcast %cst : f32 to vector<2x16x128xf32>
    %10 = arith.maximumf %8, %9 : vector<2x16x128xf32>
    %c0_6 = arith.constant 0 : index
    %c0_7 = arith.constant 0 : index
    %c0_8 = arith.constant 0 : index
    %11 = vector.load %arg4[%c0_6, %c0_7, %c0_8] : memref<2x16x128xf32, #tpu.memory_space<vmem>>, vector<2x16x128xf32>
    tpu.vector_store %arg4[%c0_6, %c0_7, %c0_8], %10 {strides = array<i32>} : memref<2x16x128xf32, #tpu.memory_space<vmem>>, vector<2x16x128xf32>,
    return
  }
  func.func @transform_0(%arg0: i32) -> (i32, i32, i32) {
    %c0_i32 = arith.constant 0 : i32
    %c0_i32_0 = arith.constant 0 : i32
    %c0_i32_1 = arith.constant 0 : i32
    return %arg0, %c0_i32, %c0_i32_0 : i32, i32, i32
  }
  func.func @transform_1(%arg0: i32) -> (i32, i32) {
    %c0_i32 = arith.constant 0 : i32
    %c0_i32_0 = arith.constant 0 : i32
    %c0_i32_1 = arith.constant 0 : i32
    return %c0_i32, %c0_i32_0 : i32, i32
  }
  func.func @transform_2(%arg0: i32) -> (i32, i32) {
    %c0_i32 = arith.constant 0 : i32
    %c0_i32_0 = arith.constant 0 : i32
    %c0_i32_1 = arith.constant 0 : i32
    return %c0_i32, %c0_i32_0 : i32, i32
  }
  func.func @transform_3(%arg0: i32) -> (i32, i32, i32) {
    %c0_i32 = arith.constant 0 : i32
    %c0_i32_0 = arith.constant 0 : i32
    %c0_i32_1 = arith.constant 0 : i32
    return %arg0, %c0_i32, %c0_i32_0 : i32, i32, i32
  }
}

</mosaic_0001>

<bundles_post_ra>
// kernel: conv_block_forward.3
= control target key start
LH: loop header
LB: loop body
LE: loop exit
PB: predicated region body
PF: predicated region fallthrough
CT: control target
= control target key end

     0   :  { %vm28_vm0 = vcmask 581632   ;;  %vm33_vm1 = vcmask 31744   ;;  %vm41_vm2 = vcmask 589344   ;;  %v1370_v3 = vmov 0.0   ;;  %s1371_s28 = smov 4   ;;  %s1372_s29 = smov 124   ;;  %s1600_s0 = inlined_call_operand.vmem [shape: f32[2,16,64], index: 0, kind: input, shape index: {}]   ;;  %s1601_s1 = inlined_call_operand.vmem [shape: f32[1,64], index: 1, kind: input, shape index: {}, may-alias: {1,2}]   ;;  %s1602_s2 = inlined_call_operand.vmem [shape: f32[1,64], index: 2, kind: input, shape index: {}, may-alias: {1,2}]   ;;  %s1603_s3 = inlined_call_operand.vmem [shape: bf16[9,64,128], index: 3, kind: input, shape index: {}]   ;;  %s1604_s4 = inlined_call_operand.vmem [shape: f32[1,128], index: 4, kind: input, shape index: {}]   ;;  %s1605_s5 = inlined_call_operand.vmem [shape: f32[2,16,128], index: 5, kind: output, shape index: {0}]   ;;  %s1606_s6 = inlined_call_operand.vmem [shape: f32[1,1,128], index: 6, kind: output, shape index: {1}]   ;;  %s1607_s7 = inlined_call_operand.vmem [shape: f32[1,1,128], index: 7, kind: output, shape index: {2}]  }
   0x1   :  { %v26_v0 = vld [vmem:[%s1600_s0 + $0x10] sm:$0xff]  ;;  %v24_v1 = vld [vmem:[%s1600_s0] sm:$0xff]  ;;  %v27_v2 = vld [vmem:[%s1600_s0 + $0x18] sm:$0xff]  ;;  %30 = vst.msk [vmem:[#allocation2 + $0x18] sm:$0x1] %vm28_vm0, %v1370_v3  ;;  %vm36_vm3 = vcmask 25600  }
   0x2   :  { %39 = vst.msk [vmem:[#allocation2 + $0x20] sm:$0xff] %vm33_vm1, %v1370_v3  ;;  %35 = vst.msk [vmem:[#allocation2 + $0x8] sm:$0xff] %vm33_vm1, %v1370_v3  ;;  %vm44_vm4 = vcmask 583200   ;;  %57 = vrot.lane.b32.xlu1 %v26_v0, %s1371_s28  ;;  %53 = vrot.lane.b32.xlu0 %v24_v1, %s1371_s28  ;;  %v25_v4 = vld [vmem:[%s1600_s0 + $0x8] sm:$0xff]  ;;  %v1334_v5 = vld [vmem:[%s1603_s3] sm:$0xff]   ;;  %vm65_vm5 = vcmask 556064  }
   0x3   :  { %29 = vst.msk [vmem:[#allocation2] sm:$0x1] %vm28_vm0, %v1370_v3  ;;  %31 = vst.msk [vmem:[#allocation2 + $0x11] sm:$0x1] %vm28_vm0, %v1370_v3  ;;  %v1335_v6 = vld [vmem:[%s1603_s3 + $0x8] sm:$0xff]   ;;  %1186 = vmatprep.subr.bf16.mxu1 %v1334_v5  ;;  %v1336_v7 = vld [vmem:[%s1603_s3 + $0x10] sm:$0xff]  }
   0x4   :  { %32 = vst.msk [vmem:[#allocation2 + $0x29] sm:$0x1] %vm28_vm0, %v1370_v3  ;;  %1187 = vmatpush3.bf16.msra.mxu1 %v1334_v5  ;;  %v1337_v8 = vld [vmem:[%s1603_s3 + $0x18] sm:$0xff]   ;;  %v1338_v9 = vld [vmem:[%s1603_s3 + $0x80] sm:$0xff]   ;;  %v1339_v10 = vld [vmem:[%s1603_s3 + $0x88] sm:$0xff]   ;;  %vm119_vm6 = vcmask 523264  }
   0x5   :  { %38 = vst.msk [vmem:[#allocation2 + $0x18] sm:$0xff] %vm33_vm1, %v1370_v3  ;;  %34 = vst.msk [vmem:[#allocation2] sm:$0xff] %vm33_vm1, %v1370_v3  ;;  %1188 = vmatprep.subr.bf16.mxu1 %v1335_v6  ;;  %v1340_v11 = vld [vmem:[%s1603_s3 + $0x20] sm:$0xff]   ;;  %1234 = vmatprep.subr.bf16.mxu0 %v1338_v9  ;;  %v1341_v12 = vld [vmem:[%s1603_s3 + $0x90] sm:$0xff]   ;;  %vm373_vm7 = vsmask.f32 7424 }
   0x6   :  { %47 = vst.msk [vmem:[#allocation2 + $0x20] sm:$0xff] %vm41_vm2, %v1370_v3  ;;  %43 = vst.msk [vmem:[#allocation2 + $0x8] sm:$0xff] %vm41_vm2, %v1370_v3  ;;  %59 = vrot.lane.b32.xlu1 %v27_v2, %s1371_s28  ;;  %55 = vrot.lane.b32.xlu0 %v25_v4, %s1371_s28  ;;  %v1343_v13 = vld [vmem:[%s1603_s3 + $0x98] sm:$0xff]   ;;  %v1464_v18 = vld [vmem:[%s1603_s3 + $0xa0] sm:$0xff]   ;;  %s1373_s9 = smov 120   ;;  %vm682_vm8 = vcmask 1046528  }
   0x7   :  { %40 = vst.msk [vmem:[#allocation2 + $0x28] sm:$0x3] %vm36_vm3, %v1370_v3  ;;  %37 = vst.msk [vmem:[#allocation2 + $0x10] sm:$0x3] %vm36_vm3, %v1370_v3  ;;  %1235 = vmatpush3.bf16.msra.mxu0 %v1338_v9  ;;  %v1342_v29 = vld [vmem:[%s1603_s3 + $0x28] sm:$0xff]   ;;  %v1344_v39 = vld [vmem:[%s1603_s3 + $0x30] sm:$0xff]  }
   0x8   :  { %46 = vst.msk [vmem:[#allocation2 + $0x18] sm:$0xff] %vm41_vm2, %v1370_v3  ;;  %42 = vst.msk [vmem:[#allocation2] sm:$0xff] %vm41_vm2, %v1370_v3  ;;  %1189 = vmatpush3.bf16.msra.mxu1 %v1335_v6  ;;  %1236 = vmatprep.subr.bf16.mxu0 %v1339_v10  ;;  %v1346_v45 = vld [vmem:[%s1603_s3 + $0x38] sm:$0xff]   ;;  %v1348_v46 = vld [vmem:[%s1603_s3 + $0x40] sm:$0xff]  }
   0x9   :  { %48 = vst.msk [vmem:[#allocation2 + $0x28] sm:$0x3] %vm44_vm4, %v1370_v3  ;;  %45 = vst.msk [vmem:[#allocation2 + $0x10] sm:$0x3] %vm44_vm4, %v1370_v3  ;;  %1190 = vmatprep.subr.bf16.mxu1 %v1336_v7  ;;  %v1347_v55 = vld [vmem:[%s1603_s3 + $0xa8] sm:$0xff]   ;;  %v1349_v58 = vld [vmem:[%s1603_s3 + $0xb0] sm:$0xff]  }
   0xa   :  { %v1350_v61 = vld [vmem:[%s1603_s3 + $0x48] sm:$0xff]   ;;  %v1351_v62 = vld [vmem:[%s1603_s3 + $0xb8] sm:$0xff]   ;;  %v1352_v0 = vld [vmem:[%s1603_s3 + $0x50] sm:$0xff]  }
   0xb   :  { %1237 = vmatpush3.bf16.msra.mxu0 %v1339_v10  ;;  %v1353_v1 = vld [vmem:[%s1603_s3 + $0xc0] sm:$0xff]   ;;  %v1354_v2 = vld [vmem:[%s1603_s3 + $0x58] sm:$0xff]   ;;  %v1355_v3 = vld [vmem:[%s1603_s3 + $0xc8] sm:$0xff]  }
   0xc   :  { %1191 = vmatpush3.bf16.msra.mxu1 %v1336_v7  ;;  %1238 = vmatprep.subr.bf16.mxu0 %v1341_v12  ;;  %v1356_v4 = vld [vmem:[%s1603_s3 + $0x60] sm:$0xff]   ;;  %v1357_v5 = vld [vmem:[%s1603_s3 + $0xd0] sm:$0xff]   ;;  %v1358_v6 = vld [vmem:[%s1603_s3 + $0x68] sm:$0xff]  }
   0xd   :  { %1192 = vmatprep.subr.bf16.mxu1 %v1337_v8  ;;  %v1360_v9 = vld [vmem:[%s1603_s3 + $0x70] sm:$0xff]   ;;  %v1361_v10 = vld [vmem:[%s1603_s3 + $0xe0] sm:$0xff]  }
   0xf   :  { %1239 = vmatpush3.bf16.msra.mxu0 %v1341_v12  ;;  %v1363_v12 = vld [vmem:[%s1603_s3 + $0xe8] sm:$0xff]  }
  0x10   :  { %1193 = vmatpush3.bf16.msra.mxu1 %v1337_v8  ;;  %1240 = vmatprep.subr.bf16.mxu0 %v1343_v13  ;;  %v1359_v8 = vld [vmem:[%s1603_s3 + $0xd8] sm:$0xff]  }
  0x11   :  { %1198 = vmatprep.subr.bf16.mxu1 %v1340_v11 }
  0x13   :  { %1241 = vmatpush3.bf16.msra.mxu0 %v1343_v13 }
  0x14   :  { %1246 = vmatprep.subr.bf16.mxu0 %v1464_v18 }
  0x74   :  { %v58_v14 = vpop.permute.xlu1 %57  ;;  %v54_v15 = vpop.permute.xlu0 %53 }
  0x75   :  { %68 = vst.msk [vmem:[#allocation2 + $0x19] sm:$0xff] %vm65_vm5, %v58_v14  ;;  %66 = vst.msk [vmem:[#allocation2 + $0x1] sm:$0xff] %vm65_vm5, %v54_v15  ;;  %v1364_v14 = vld [vmem:[%s1603_s3 + $0xf0] sm:$0xff]   ;;  %v1365_v15 = vld [vmem:[%s1603_s3 + $0xf8] sm:$0xff]  }
  0x78   :  { %v60_v16 = vpop.permute.xlu1 %59  ;;  %v56_v17 = vpop.permute.xlu0 %55 }
  0x79   :  { %69 = vst.msk [vmem:[#allocation2 + $0x21] sm:$0xff] %vm65_vm5, %v60_v16  ;;  %67 = vst.msk [vmem:[#allocation2 + $0x9] sm:$0xff] %vm65_vm5, %v56_v17  ;;  %v1366_v16 = vld [vmem:[%s1603_s3 + $0x100] sm:$0xff]   ;;  %v1367_v17 = vld [vmem:[%s1603_s3 + $0x108] sm:$0xff]  }
  0x7c   :  { %v70_v19 = vld [vmem:[#allocation2] sm:$0xff]  ;;  %v73_v20 = vld [vmem:[#allocation2 + $0x18] sm:$0xff] }
  0x80   :  { %v71_v21 = vld [vmem:[#allocation2 + $0x8] sm:$0xff]  ;;  %v74_v22 = vld [vmem:[#allocation2 + $0x20] sm:$0xff]  ;;  %v72_v27 = vld [vmem:[#allocation2 + $0x10] sm:$0x3] }
  0x81   :  { %v75_v23 = vld [vmem:[#allocation2 + $0x28] sm:$0x3]  ;;  %v76_v24 = vpack.c.bf16 %v71_v21, %v70_v19  ;;  %v78_v25 = vpack.c.bf16 %v74_v22, %v73_v20  ;;  %v77_v28 = vpack.c.bf16 %v72_v27, %v72_v27  ;;  %v1368_v20 = vld [vmem:[%s1603_s3 + $0x110] sm:$0xff]   ;;  %v1369_v21 = vld [vmem:[%s1603_s3 + $0x118] sm:$0xff]  }
  0x82   :  { %v79_v26 = vpack.c.bf16 %v75_v23, %v75_v23  ;;  %v1013_v27 = vld [vmem:[%s1604_s4] ss:$0 sm:$0xff] }
  0x83   :  { %1194 = vmatprep.mubr.msk.bf16.mxu1 %vm119_vm6, %v76_v24  ;;  %v387_v30 = vshll.u32 %v78_v25, 16  ;;  %v376_v32 = vshll.u32 %v76_v24, 16  ;;  %v381_v33 = vshll.u32 %v77_v28, 16  ;;  %v385_v34 = vshrl.u32 %v78_v25, 16 }
  0x84   :  { %v392_v31 = vshll.u32 %v79_v26, 16  ;;  %1195 = vmatmul.mubr.msk.bf16.vlgmr.msra.gmra.mrb[0].mxu1 %vm119_vm6, %v78_v25  ;;  %v374_v37 = vshrl.u32 %v76_v24, 16  ;;  %v686_v47 = vrot.slane %v78_v25, 1  ;;  %v687_v48 = vrot.slane %v79_v26, 1 }
  0x85   :  { %v389_v35 = vrot.slane %v387_v30, 1  ;;  %1199 = vmatpush3.bf16.msra.mxu1 %v1340_v11  ;;  %v378_v38 = vrot.slane %v376_v32, 1  ;;  %v383_v42 = vrot.slane %v381_v33, 1  ;;  %v683_v49 = vrot.slane %v76_v24, 1  ;;  %v1362_v11 = vld [vmem:[%s1603_s3 + $0x78] sm:$0xff]  }
  0x86   :  { %v394_v36 = vrot.slane %v392_v31, 1  ;;  %1200 = vmatprep.subr.bf16.mxu1 %v1342_v29  ;;  %v684_v50 = vrot.slane %v77_v28, 1  ;;  %v1489_v51 = vsel %vm682_vm8, %v686_v47, %v687_v48 }
  0x87   :  { %v390_v40 = vor.u32 %v389_v35, %v385_v34  ;;  %v379_v41 = vor.u32 %v378_v38, %v374_v37 }
  0x88   :  { %v685_v52 = vsel %vm682_vm8, %v683_v49, %v684_v50 }
  0x89   :  { %v1475_v43 = vsel %vm373_vm7, %v390_v40, %v394_v36  ;;  %1201 = vmatpush3.bf16.msra.mxu1 %v1342_v29  ;;  %v1478_v44 = vsel %vm373_vm7, %v379_v41, %v383_v42 }
  0x8a   :  { %499 = vrot.lane.b32.xlu1 %v1475_v43, %s1372_s29  ;;  %1202 = vmatprep.subr.bf16.mxu1 %v1344_v39 }
  0x8b   :  { %497 = vrot.lane.b32.xlu0 %v1478_v44, %s1372_s29 }
  0x8d   :  { %1203 = vmatpush3.bf16.msra.mxu1 %v1344_v39 }
  0x8e   :  { %595 = vrot.lane.b32.xlu1 %v1475_v43, %s1373_s9  ;;  %1204 = vmatprep.subr.bf16.mxu1 %v1346_v45 }
  0x8f   :  { %593 = vrot.lane.b32.xlu0 %v1478_v44, %s1373_s9 }
  0x91   :  { %1205 = vmatpush3.bf16.msra.mxu1 %v1346_v45 }
  0x92   :  { %192 = vrot.lane.b32.xlu1 %v78_v25, %s1372_s29  ;;  %1210 = vmatprep.subr.bf16.mxu1 %v1348_v46 }
  0x93   :  { %190 = vrot.lane.b32.xlu0 %v76_v24, %s1372_s29 }
  0x96   :  { %288 = vrot.lane.b32.xlu1 %v78_v25, %s1373_s9 }
  0x97   :  { %286 = vrot.lane.b32.xlu0 %v76_v24, %s1373_s9 }
  0x9a   :  { %792 = vrot.lane.b32.xlu1 %v1489_v51, %s1372_s29 }
  0x9b   :  { %790 = vrot.lane.b32.xlu0 %v685_v52, %s1372_s29 }
  0x9e   :  { %888 = vrot.lane.b32.xlu1 %v1489_v51, %s1373_s9 }
  0x9f   :  { %886 = vrot.lane.b32.xlu0 %v685_v52, %s1373_s9 }
  0xfc   :  { %v500_v53 = vpop.permute.xlu1 %499 }
  0xfd   :  { %v498_v54 = vpop.permute.xlu0 %497 }
  0xfe   :  { %1242 = vmatprep.mubr.msk.bf16.mxu0 %vm119_vm6, %v498_v54 }
  0xff   :  { %1243 = vmatmul.mubr.msk.bf16.vlgmr.msra.gmra.mrb[0].mxu0 %vm119_vm6, %v500_v53 }
 0x100   :  { %1247 = vmatpush3.bf16.msra.mxu0 %v1464_v18  ;;  %v596_v56 = vpop.permute.xlu1 %595 }
 0x101   :  { %v594_v57 = vpop.permute.xlu0 %593  ;;  %1248 = vmatprep.subr.bf16.mxu0 %v1347_v55 }
 0x102   :  { %1254 = vmatprep.mubr.msk.bf16.mxu0 %vm119_vm6, %v594_v57 }
 0x104   :  { %1249 = vmatpush3.bf16.msra.mxu0 %v1347_v55  ;;  %v193_v59 = vpop.permute.xlu1 %192 }
 0x105   :  { %v191_v60 = vpop.permute.xlu0 %190  ;;  %1250 = vmatprep.subr.bf16.mxu0 %v1349_v58 }
 0x106   :  { %1206 = vmatprep.mubr.msk.bf16.mxu1 %vm119_vm6, %v191_v60 }
 0x107   :  { %1207 = vmatmul.mubr.msk.bf16.vlgmr.msra.gmra.mrb[0].mxu1 %vm119_vm6, %v193_v59 }
 0x108   :  { %1211 = vmatpush3.bf16.msra.mxu1 %v1348_v46  ;;  %1251 = vmatpush3.bf16.msra.mxu0 %v1349_v58  ;;  %v289_v7 = vpop.permute.xlu1 %288 }
 0x109   :  { %v287_v63 = vpop.permute.xlu0 %286  ;;  %1212 = vmatprep.subr.bf16.mxu1 %v1350_v61  ;;  %1252 = vmatprep.subr.bf16.mxu0 %v1351_v62 }
 0x10a   :  { %1218 = vmatprep.mubr.msk.bf16.mxu1 %vm119_vm6, %v287_v63 }
 0x10c   :  { %1213 = vmatpush3.bf16.msra.mxu1 %v1350_v61  ;;  %1253 = vmatpush3.bf16.msra.mxu0 %v1351_v62  ;;  %v793_v18 = vpop.permute.xlu1 %792 }
 0x10d   :  { %1214 = vmatprep.subr.bf16.mxu1 %v1352_v0  ;;  %1258 = vmatprep.subr.bf16.mxu0 %v1353_v1  ;;  %v791_v13 = vpop.permute.xlu0 %790 }
 0x10f   :  { %1255 = vmatmul.mubr.msk.bf16.vlgmr.msra.gmra.mrb[0].mxu0 %vm119_vm6, %v596_v56 }
 0x110   :  { %1215 = vmatpush3.bf16.msra.mxu1 %v1352_v0  ;;  %1259 = vmatpush3.bf16.msra.mxu0 %v1353_v1  ;;  %v889_v22 = vpop.permute.xlu1 %888 }
 0x111   :  { %1266 = vmatprep.mubr.msk.bf16.mxu0 %vm119_vm6, %v685_v52  ;;  %1216 = vmatprep.subr.bf16.mxu1 %v1354_v2  ;;  %v887_v19 = vpop.permute.xlu0 %886 }
 0x112   :  { %1260 = vmatprep.subr.bf16.mxu0 %v1355_v3 }
 0x114   :  { %1217 = vmatpush3.bf16.msra.mxu1 %v1354_v2  ;;  %1261 = vmatpush3.bf16.msra.mxu0 %v1355_v3 }
 0x115   :  { %1222 = vmatprep.subr.bf16.mxu1 %v1356_v4  ;;  %1262 = vmatprep.subr.bf16.mxu0 %v1357_v5 }
 0x117   :  { %1219 = vmatmul.mubr.msk.bf16.vlgmr.msra.gmra.mrb[0].mxu1 %vm119_vm6, %v289_v7 }
 0x118   :  { %1223 = vmatpush3.bf16.msra.mxu1 %v1356_v4  ;;  %1230 = vmatprep.mubr.msk.bf16.mxu1 %vm119_vm6, %v1478_v44 }
 0x119   :  { %1263 = vmatpush3.bf16.msra.mxu0 %v1357_v5  ;;  %1224 = vmatprep.subr.bf16.mxu1 %v1358_v6 }
 0x11a   :  { %1264 = vmatprep.subr.bf16.mxu0 %v1359_v8 }
 0x11c   :  { %1225 = vmatpush3.bf16.msra.mxu1 %v1358_v6 }
 0x11d   :  { %1265 = vmatpush3.bf16.msra.mxu0 %v1359_v8  ;;  %1226 = vmatprep.subr.bf16.mxu1 %v1360_v9 }
 0x11e   :  { %1270 = vmatprep.subr.bf16.mxu0 %v1361_v10 }
 0x120   :  { %1267 = vmatmul.mubr.msk.bf16.vlgmr.msra.gmra.mrb[0].mxu0 %vm119_vm6, %v1489_v51  ;;  %1227 = vmatpush3.bf16.msra.mxu1 %v1360_v9 }
 0x121   :  { %1271 = vmatpush3.bf16.msra.mxu0 %v1361_v10  ;;  %1278 = vmatprep.mubr.msk.bf16.mxu0 %vm119_vm6, %v791_v13 }
 0x122   :  { %1228 = vmatprep.subr.bf16.mxu1 %v1362_v11  ;;  %1272 = vmatprep.subr.bf16.mxu0 %v1363_v12 }
 0x124   :  { %1229 = vmatpush3.bf16.msra.mxu1 %v1362_v11 }
 0x125   :  { %1273 = vmatpush3.bf16.msra.mxu0 %v1363_v12 }
 0x126   :  { %1274 = vmatprep.subr.bf16.mxu0 %v1364_v14 }
 0x127   :  { %1231 = vmatmul.mubr.msk.bf16.vlgmr.msra.gmra.mrb[0].mxu1 %vm119_vm6, %v1475_v43 }
 0x129   :  { %1275 = vmatpush3.bf16.msra.mxu0 %v1364_v14 }
 0x12a   :  { %1276 = vmatprep.subr.bf16.mxu0 %v1365_v15 }
 0x12d   :  { %1277 = vmatpush3.bf16.msra.mxu0 %v1365_v15 }
 0x12e   :  { %1282 = vmatprep.subr.bf16.mxu0 %v1366_v16 }
 0x130   :  { %1279 = vmatmul.mubr.msk.bf16.vlgmr.msra.gmra.mrb[0].mxu0 %vm119_vm6, %v793_v18 }
 0x131   :  { %1283 = vmatpush3.bf16.msra.mxu0 %v1366_v16  ;;  %1290 = vmatprep.mubr.msk.bf16.mxu0 %vm119_vm6, %v887_v19 }
 0x132   :  { %1284 = vmatprep.subr.bf16.mxu0 %v1367_v17 }
 0x135   :  { %1285 = vmatpush3.bf16.msra.mxu0 %v1367_v17 }
 0x136   :  { %1286 = vmatprep.subr.bf16.mxu0 %v1368_v20 }
 0x139   :  { %1287 = vmatpush3.bf16.msra.mxu0 %v1368_v20 }
 0x13a   :  { %1288 = vmatprep.subr.bf16.mxu0 %v1369_v21 }
 0x13d   :  { %1289 = vmatpush3.bf16.msra.mxu0 %v1369_v21 }
 0x140   :  { %1291 = vmatmul.mubr.msk.bf16.vlgmr.msra.gmra.mrb[0].mxu0 %vm119_vm6, %v889_v22 }
 0x1fa   :  { %v1232_v23 = vpop.f32.mrb[0].mxu1 }
 0x1fb   :  { %v469_v24 = vpop.f32.mrb[1].mxu1  ;;  %v1294_v28 = vadd.f32 %v1232_v23, %v1013_v27 }
 0x1fc   :  { %v1233_v25 = vpop.f32.mrb[2].mxu1  ;;  %v1296_v29 = vadd.f32 %v1013_v27, %v469_v24 }
 0x1fd   :  { %v472_v26 = vpop.f32.mrb[3].mxu1  ;;  %v1298_v31 = vadd.f32 %v1233_v25, %v1013_v27 }
 0x1fe   :  { %v1300_v34 = vadd.f32 %v1013_v27, %v472_v26 }
 0x213   :  { %v1292_v30 = vpop.f32.mrb[0].mxu0 }
 0x214   :  { %v1295_v32 = vadd.f32 %v1294_v28, %v1292_v30  ;;  %v954_v33 = vpop.f32.mrb[1].mxu0 }
 0x215   :  { %v1297_v35 = vadd.f32 %v1296_v29, %v954_v33  ;;  %v1293_v36 = vpop.f32.mrb[2].mxu0 }
 0x216   :  { %975 = vst [vmem:[%s1605_s5 + $0x10] sm:$0xff] %v1295_v32  ;;  %v1299_v37 = vadd.f32 %v1298_v31, %v1293_v36  ;;  %v957_v38 = vpop.f32.mrb[3].mxu0  ;;  %v989_v43 = vmul.f32 %v1295_v32, %v1295_v32 }
 0x217   :  { %973 = vst [vmem:[%s1605_s5] sm:$0xff] %v1297_v35  ;;  %v1301_v39 = vadd.f32 %v1300_v34, %v957_v38  ;;  %v987_v40 = vmul.f32 %v1297_v35, %v1297_v35 }
 0x218   :  { %976 = vst [vmem:[%s1605_s5 + $0x18] sm:$0xff] %v1299_v37  ;;  %v990_v46 = vmul.f32 %v1299_v37, %v1299_v37 }
 0x219   :  { %974 = vst [vmem:[%s1605_s5 + $0x8] sm:$0xff] %v1301_v39  ;;  %v977_v41 = vadd.f32 %v1301_v39, %v1297_v35  ;;  %v988_v42 = vmul.f32 %v1301_v39, %v1301_v39 }
 0x21b   :  { %v978_v44 = vadd.f32 %v1295_v32, %v977_v41  ;;  %v991_v45 = vadd.f32 %v988_v42, %v987_v40 }
 0x21d   :  { %v979_v47 = vadd.f32 %v1299_v37, %v978_v44  ;;  %v992_v48 = vadd.f32 %v991_v45, %v989_v43 }
 0x21f   :  { %v980_v49 = vrot.slane %v979_v47, 4  ;;  %v993_v50 = vadd.f32 %v992_v48, %v990_v46 }
 0x221   :  { %v981_v51 = vadd.f32 %v980_v49, %v979_v47  ;;  %v994_v52 = vrot.slane %v993_v50, 4 }
 0x223   :  { %v982_v53 = vrot.slane %v981_v51, 2  ;;  %v995_v54 = vadd.f32 %v994_v52, %v993_v50 }
 0x225   :  { %v983_v55 = vadd.f32 %v982_v53, %v981_v51  ;;  %v996_v56 = vrot.slane %v995_v54, 2 }
 0x227   :  { %v984_v57 = vrot.slane %v983_v55, 1  ;;  %v997_v58 = vadd.f32 %v996_v56, %v995_v54 }
 0x229   :  { %v985_v59 = vadd.f32 %v984_v57, %v983_v55  ;;  %v998_v60 = vrot.slane %v997_v58, 1 }
 0x22b   :  { %986 = vst [vmem:[%s1606_s6] sm:$0x1] %v985_v59  ;;  %v999_v61 = vadd.f32 %v998_v60, %v997_v58 }
 0x22d   :  { %1000 = vst [vmem:[%s1607_s7] sm:$0x1] %v999_v61 }

// kernel: conv_block_forward.4
= control target key start
LH: loop header
LB: loop body
LE: loop exit
PB: predicated region body
PF: predicated region fallthrough
CT: control target
= control target key end

     0   :  { %v54_v0 = vlaneseq  ;;  %vm69_vm0 = vcmask 64512   ;;  %vm77_vm1 = vcmask 130112   ;;  %v1992_v4 = vmov 0.0   ;;  %s1993_s16 = smov 8   ;;  %s1994_s27 = smov 120   ;;  %s2419_s0 = inlined_call_operand.vmem [shape: f32[2,16,128], index: 0, kind: input, shape index: {}]   ;;  %s2420_s1 = inlined_call_operand.vmem [shape: f32[1,128], index: 1, kind: input, shape index: {}]   ;;  %s2421_s2 = inlined_call_operand.vmem [shape: f32[1,128], index: 2, kind: input, shape index: {}]   ;;  %s2422_s3 = inlined_call_operand.vmem [shape: bf16[9,128,128], index: 3, kind: input, shape index: {}]   ;;  %s2423_s4 = inlined_call_operand.vmem [shape: f32[1,128], index: 4, kind: input, shape index: {}]   ;;  %s2424_s5 = inlined_call_operand.vmem [shape: f32[2,16,128], index: 5, kind: output, shape index: {0}]   ;;  %s2425_s6 = inlined_call_operand.vmem [shape: f32[1,1,128], index: 6, kind: output, shape index: {1}]   ;;  %s2426_s7 = inlined_call_operand.vmem [shape: f32[1,1,128], index: 7, kind: output, shape index: {2}]  }
   0x1   :  { %v26_v1 = vld [vmem:[%s2419_s0 + $0x10] sm:$0xff]  ;;  %v1407_v2 = vld [vmem:[%s2420_s1] ss:$0 sm:$0xff]  ;;  %71 = vst.msk [vmem:[#allocation2 + $0x10] sm:$0xff] %vm69_vm0, %v1992_v4  ;;  %75 = vst.msk [vmem:[#allocation2 + $0x40] sm:$0xff] %vm69_vm0, %v1992_v4  ;;  %vm72_vm3 = vcmask 58368  }
   0x2   :  { %v1408_v3 = vld [vmem:[%s2421_s2] ss:$0 sm:$0xff]  ;;  %v37_v5 = vmul.f32 %v1407_v2, %v26_v1  ;;  %v27_v7 = vld [vmem:[%s2419_s0 + $0x18] sm:$0xff]  ;;  %v25_v8 = vld [vmem:[%s2419_s0 + $0x8] sm:$0xff]  ;;  %vm56_vm2 = vcmp.lt.s32.totalorder %v54_v0, 144  ;;  %79 = vst.msk [vmem:[#allocation2 + $0x18] sm:$0xff] %vm77_vm1, %v1992_v4 }
   0x3   :  { %v24_v6 = vld [vmem:[%s2419_s0] sm:$0xff]  ;;  %83 = vst.msk [vmem:[#allocation2 + $0x48] sm:$0xff] %vm77_vm1, %v1992_v4  ;;  %v38_v10 = vmul.f32 %v1407_v2, %v27_v7  ;;  %v36_v11 = vmul.f32 %v1407_v2, %v25_v8  ;;  %v1921_v14 = vld [vmem:[%s2422_s3 + $0x8] sm:$0xff]   ;;  %vm80_vm4 = vcmask 123968   ;;  %v1922_v22 = vld [vmem:[%s2422_s3 + $0x10] sm:$0xff]   ;;  %vm89_vm5 = vcmask 1040384  }
   0x4   :  { %v35_v9 = vmul.f32 %v1407_v2, %v24_v6  ;;  %v1920_v12 = vld [vmem:[%s2422_s3] sm:$0xff]   ;;  %61 = vst.msk [vmem:[#allocation2 + $0x30] ss:$8 sm:$0x3] %vm56_vm2, %v1992_v4  ;;  %v48_v13 = vadd.f32 %v1408_v3, %v37_v5  ;;  %v1923_v28 = vld [vmem:[%s2422_s3 + $0x18] sm:$0xff]   ;;  %v1925_v31 = vld [vmem:[%s2422_s3 + $0x28] sm:$0xff]  }
   0x5   :  { %58 = vst.msk [vmem:[#allocation2] ss:$8 sm:$0x3] %vm56_vm2, %v1992_v4  ;;  %64 = vst.msk [vmem:[#allocation2 + $0x21] ss:$8 sm:$0x3] %vm56_vm2, %v1992_v4  ;;  %v49_v16 = vadd.f32 %v1408_v3, %v38_v10  ;;  %v47_v17 = vadd.f32 %v1408_v3, %v36_v11  ;;  %1700 = vmatprep.subr.bf16.mxu1 %v1920_v12 }
   0x6   :  { %67 = vst.msk [vmem:[#allocation2 + $0x51] ss:$8 sm:$0x3] %vm56_vm2, %v1992_v4  ;;  %v46_v15 = vadd.f32 %v1408_v3, %v35_v9  ;;  %v52_v18 = vmax.f32 %v48_v13, 0.0  ;;  %1701 = vmatpush3.bf16.msra.mxu1 %v1920_v12  ;;  %v1924_v30 = vld [vmem:[%s2422_s3 + $0x20] sm:$0xff]   ;;  %v1926_v32 = vld [vmem:[%s2422_s3 + $0x30] sm:$0xff]  }
   0x7   :  { %74 = vst.msk [vmem:[#allocation2 + $0x30] sm:$0xff] %vm69_vm0, %v1992_v4  ;;  %70 = vst.msk [vmem:[#allocation2] sm:$0xff] %vm69_vm0, %v1992_v4  ;;  %v53_v20 = vmax.f32 %v49_v16, 0.0  ;;  %v51_v21 = vmax.f32 %v47_v17, 0.0  ;;  %1702 = vmatprep.subr.bf16.mxu1 %v1921_v14  ;;  %v1927_v33 = vld [vmem:[%s2422_s3 + $0x38] sm:$0xff]   ;;  %v1928_v34 = vld [vmem:[%s2422_s3 + $0x100] sm:$0xff]  }
   0x8   :  { %82 = vst.msk [vmem:[#allocation2 + $0x38] sm:$0xff] %vm77_vm1, %v1992_v4  ;;  %78 = vst.msk [vmem:[#allocation2 + $0x8] sm:$0xff] %vm77_vm1, %v1992_v4  ;;  %v50_v19 = vmax.f32 %v46_v15, 0.0  ;;  %v93_v23 = vrot.slane %v52_v18, 7  ;;  %v1929_v35 = vld [vmem:[%s2422_s3 + $0x108] sm:$0xff]   ;;  %v2095_v36 = vld [vmem:[%s2422_s3 + $0x40] sm:$0xff]   ;;  %1780 = vmatprep.subr.bf16.mxu0 %v1928_v34 }
   0x9   :  { %76 = vst.msk [vmem:[#allocation2 + $0x50] sm:$0x3] %vm72_vm3, %v1992_v4  ;;  %73 = vst.msk [vmem:[#allocation2 + $0x20] sm:$0x3] %vm72_vm3, %v1992_v4  ;;  %v94_v25 = vrot.slane %v53_v20, 7  ;;  %v91_v26 = vrot.slane %v51_v21, 7  ;;  %1781 = vmatpush3.bf16.msra.mxu0 %v1928_v34 }
   0xa   :  { %84 = vst.msk [vmem:[#allocation2 + $0x58] sm:$0x3] %vm80_vm4, %v1992_v4  ;;  %81 = vst.msk [vmem:[#allocation2 + $0x28] sm:$0x3] %vm80_vm4, %v1992_v4  ;;  %v90_v24 = vrot.slane %v50_v19, 7  ;;  %102 = vrot.lane.b32.xlu1 %v93_v23, %s1993_s16  ;;  %1703 = vmatpush3.bf16.msra.mxu1 %v1921_v14  ;;  %v1930_v37 = vld [vmem:[%s2422_s3 + $0x110] sm:$0xff]  }
   0xb   :  { %v95_v27 = vsel %vm89_vm5, %v93_v23, %v94_v25  ;;  %1704 = vmatprep.subr.bf16.mxu1 %v1922_v22  ;;  %1782 = vmatprep.subr.bf16.mxu0 %v1929_v35  ;;  %v1931_v38 = vld [vmem:[%s2422_s3 + $0x118] sm:$0xff]   ;;  %v1933_v39 = vld [vmem:[%s2422_s3 + $0x120] sm:$0xff]   ;;  %v1935_v40 = vld [vmem:[%s2422_s3 + $0x128] sm:$0xff]   ;;  %vm114_vm6 = vcmask 1047617   ;;  %vm116_vm7 = vcmask 64513   ;;  %vm118_vm8 = vcmask 1047616  }
   0xc   :  { %96 = vrot.lane.b32.xlu0 %v90_v24, %s1993_s16  ;;  %v92_v29 = vsel %vm89_vm5, %v90_v24, %v91_v26  ;;  %v1937_v41 = vld [vmem:[%s2422_s3 + $0x130] sm:$0xff]   ;;  %vm121_vm9 = vcmask 1040448   ;;  %vm123_vm10 = vcmask 57344   ;;  %v1939_v50 = vld [vmem:[%s2422_s3 + $0x138] sm:$0xff]   ;;  %v1934_v61 = vld [vmem:[%s2422_s3 + $0x48] sm:$0xff]   ;;  %s1995_s9 = smov 112  }
   0xd   :  { %1783 = vmatpush3.bf16.msra.mxu0 %v1929_v35  ;;  %v2132_v62 = vld [vmem:[%s2422_s3 + $0x140] sm:$0xff]   ;;  %v1936_v14 = vld [vmem:[%s2422_s3 + $0x50] sm:$0xff]   ;;  %vm541_vm11 = vsmask.f32 7424  ;;  %vm972_vm12 = vcmask 1046528   ;;  %vm304_vm13 = vcmask 982016  }
   0xe   :  { %104 = vrot.lane.b32.xlu1 %v95_v27, %s1993_s16  ;;  %1705 = vmatpush3.bf16.msra.mxu1 %v1922_v22  ;;  %v1940_v35 = vld [vmem:[%s2422_s3 + $0x60] sm:$0xff]   ;;  %vm435_vm14 = vcmask 916480  }
   0xf   :  { %1706 = vmatprep.subr.bf16.mxu1 %v1923_v28  ;;  %1784 = vmatprep.subr.bf16.mxu0 %v1930_v37 }
  0x10   :  { %98 = vrot.lane.b32.xlu0 %v92_v29, %s1993_s16 }
  0x11   :  { %1785 = vmatpush3.bf16.msra.mxu0 %v1930_v37 }
  0x12   :  { %106 = vrot.lane.b32.xlu1 %v94_v25, %s1993_s16  ;;  %1707 = vmatpush3.bf16.msra.mxu1 %v1923_v28  ;;  %v1938_v28 = vld [vmem:[%s2422_s3 + $0x58] sm:$0xff]  }
  0x13   :  { %1708 = vmatprep.subr.bf16.mxu1 %v1924_v30  ;;  %1786 = vmatprep.subr.bf16.mxu0 %v1931_v38 }
  0x14   :  { %100 = vrot.lane.b32.xlu0 %v91_v26, %s1993_s16 }
  0x15   :  { %1787 = vmatpush3.bf16.msra.mxu0 %v1931_v38  ;;  %v1942_v38 = vld [vmem:[%s2422_s3 + $0x68] sm:$0xff]  }
  0x16   :  { %1709 = vmatpush3.bf16.msra.mxu1 %v1924_v30  ;;  %1788 = vmatprep.subr.bf16.mxu0 %v1933_v39 }
  0x17   :  { %1710 = vmatprep.subr.bf16.mxu1 %v1925_v31 }
  0x19   :  { %1789 = vmatpush3.bf16.msra.mxu0 %v1933_v39  ;;  %v1944_v39 = vld [vmem:[%s2422_s3 + $0x70] sm:$0xff]  }
  0x1a   :  { %1711 = vmatpush3.bf16.msra.mxu1 %v1925_v31  ;;  %1790 = vmatprep.subr.bf16.mxu0 %v1935_v40 }
  0x1b   :  { %1712 = vmatprep.subr.bf16.mxu1 %v1926_v32 }
  0x1d   :  { %1791 = vmatpush3.bf16.msra.mxu0 %v1935_v40  ;;  %v1946_v40 = vld [vmem:[%s2422_s3 + $0x78] sm:$0xff]  }
  0x1e   :  { %1713 = vmatpush3.bf16.msra.mxu1 %v1926_v32  ;;  %1792 = vmatprep.subr.bf16.mxu0 %v1937_v41 }
  0x1f   :  { %1714 = vmatprep.subr.bf16.mxu1 %v1927_v33 }
  0x21   :  { %1793 = vmatpush3.bf16.msra.mxu0 %v1937_v41  ;;  %v2203_v41 = vld [vmem:[%s2422_s3 + $0x80] sm:$0xff]  }
  0x22   :  { %1715 = vmatpush3.bf16.msra.mxu1 %v1927_v33  ;;  %1794 = vmatprep.subr.bf16.mxu0 %v1939_v50 }
  0x23   :  { %1720 = vmatprep.subr.bf16.mxu1 %v2095_v36 }
  0x25   :  { %1795 = vmatpush3.bf16.msra.mxu0 %v1939_v50 }
  0x26   :  { %1800 = vmatprep.subr.bf16.mxu0 %v2132_v62 }
  0x7c   :  { %v103_v42 = vpop.permute.xlu1 %102 }
  0x7d   :  { %125 = vst.msk [vmem:[#allocation2 + $0x30] sm:$0xfe] %vm114_vm6, %v103_v42 }
  0x7e   :  { %126 = vst.msk [vmem:[#allocation2 + $0x38] sm:$0xfe] %vm116_vm7, %v103_v42  ;;  %v97_v43 = vpop.permute.xlu0 %96 }
  0x7f   :  { %115 = vst.msk [vmem:[#allocation2] sm:$0xfe] %vm114_vm6, %v97_v43 }
  0x80   :  { %117 = vst.msk [vmem:[#allocation2 + $0x8] sm:$0xfe] %vm116_vm7, %v97_v43  ;;  %v105_v44 = vpop.permute.xlu1 %104 }
  0x81   :  { %127 = vst.msk [vmem:[#allocation2 + $0x40] sm:$0xff] %vm118_vm8, %v105_v44 }
  0x82   :  { %128 = vst.msk [vmem:[#allocation2 + $0x48] sm:$0xff] %vm69_vm0, %v105_v44  ;;  %v99_v45 = vpop.permute.xlu0 %98 }
  0x83   :  { %119 = vst.msk [vmem:[#allocation2 + $0x10] sm:$0xff] %vm118_vm8, %v99_v45 }
  0x84   :  { %120 = vst.msk [vmem:[#allocation2 + $0x18] sm:$0xff] %vm69_vm0, %v99_v45  ;;  %v107_v46 = vpop.permute.xlu1 %106  ;;  %v134_v48 = vld [vmem:[#allocation2 + $0x30] sm:$0xff] }
  0x85   :  { %129 = vst.msk [vmem:[#allocation2 + $0x50] sm:$0x1] %vm121_vm9, %v107_v46  ;;  %v144_v49 = vld [vmem:[#allocation2 + $0x38] sm:$0xff] }
  0x86   :  { %130 = vst.msk [vmem:[#allocation2 + $0x58] sm:$0x1] %vm123_vm10, %v107_v46  ;;  %v101_v47 = vpop.permute.xlu0 %100  ;;  %v131_v51 = vld [vmem:[#allocation2] sm:$0xff] }
  0x87   :  { %122 = vst.msk [vmem:[#allocation2 + $0x20] sm:$0x1] %vm121_vm9, %v101_v47  ;;  %v141_v56 = vld [vmem:[#allocation2 + $0x8] sm:$0xff] }
  0x88   :  { %124 = vst.msk [vmem:[#allocation2 + $0x28] sm:$0x1] %vm123_vm10, %v101_v47  ;;  %v135_v52 = vld [vmem:[#allocation2 + $0x40] sm:$0xff] }
  0x89   :  { %v145_v53 = vld [vmem:[#allocation2 + $0x48] sm:$0xff]  ;;  %v2118_v55 = vpack.c.bf16 %v135_v52, %v134_v48 }
  0x8a   :  { %v132_v54 = vld [vmem:[#allocation2 + $0x10] sm:$0xff]  ;;  %v2120_v58 = vpack.c.bf16 %v145_v53, %v144_v49 }
  0x8b   :  { %v142_v57 = vld [vmem:[#allocation2 + $0x18] sm:$0xff]  ;;  %v2122_v59 = vpack.c.bf16 %v132_v54, %v131_v51  ;;  %v557_v6 = vshll.u32 %v2118_v55, 16  ;;  %v555_v27 = vshrl.u32 %v2118_v55, 16  ;;  %v976_v51 = vrot.slane %v2118_v55, 1 }
  0x8c   :  { %v2124_v60 = vpack.c.bf16 %v142_v57, %v141_v56  ;;  %v701_v5 = vshll.u32 %v2120_v58, 16  ;;  %v136_v11 = vld [vmem:[#allocation2 + $0x50] sm:$0x3]  ;;  %v699_v26 = vshrl.u32 %v2120_v58, 16  ;;  %v1104_v50 = vrot.slane %v2120_v58, 1 }
  0x8d   :  { %1716 = vmatprep.mubr.bf16.mxu1 %v2122_v59  ;;  %v545_v0 = vshll.u32 %v2122_v59, 16  ;;  %v146_v1 = vld [vmem:[#allocation2 + $0x58] sm:$0x3]  ;;  %v2149_v13 = vpack.c.bf16 %v136_v11, %v136_v11  ;;  %v543_v16 = vshrl.u32 %v2122_v59, 16  ;;  %v559_v20 = vrot.slane %v557_v6, 1  ;;  %v1949_v6 = vld [vmem:[%s2422_s3 + $0x160] sm:$0xff]  }
  0x8e   :  { %v689_v63 = vshll.u32 %v2124_v60, 16  ;;  %1717 = vmatmul.mubr.bf16.vlgmr.msra.gmra.mrb[0].mxu1 %v2118_v55  ;;  %v133_v3 = vld [vmem:[#allocation2 + $0x20] sm:$0x3]  ;;  %v2138_v4 = vpack.c.bf16 %v146_v1, %v146_v1  ;;  %v687_v12 = vshrl.u32 %v2124_v60, 16  ;;  %v703_v19 = vrot.slane %v701_v5, 1  ;;  %v1951_v11 = vld [vmem:[%s2422_s3 + $0x168] sm:$0xff]  }
  0x8f   :  { %v143_v2 = vld [vmem:[#allocation2 + $0x28] sm:$0x3]  ;;  %v2145_v9 = vpack.c.bf16 %v133_v3, %v133_v3  ;;  %v547_v10 = vrot.slane %v545_v0, 1  ;;  %1721 = vmatpush3.bf16.msra.mxu1 %v2095_v36  ;;  %v562_v21 = vshll.u32 %v2149_v13, 16  ;;  %v560_v34 = vor.u32 %v559_v20, %v555_v27  ;;  %v1945_v0 = vld [vmem:[%s2422_s3 + $0x150] sm:$0xff]   ;;  %v1956_v20 = vld [vmem:[%s2422_s3 + $0xa0] sm:$0xff]  }
  0x90   :  { %v2143_v7 = vpack.c.bf16 %v143_v2, %v143_v2  ;;  %v691_v8 = vrot.slane %v689_v63, 1  ;;  %1722 = vmatprep.subr.bf16.mxu1 %v1934_v61  ;;  %v706_v18 = vshll.u32 %v2138_v4, 16  ;;  %v704_v33 = vor.u32 %v703_v19, %v699_v26  ;;  %v1955_v19 = vld [vmem:[%s2422_s3 + $0x178] sm:$0xff]   ;;  %v1961_v26 = vld [vmem:[%s2422_s3 + $0x190] sm:$0xff]  }
  0x91   :  { %v550_v17 = vshll.u32 %v2145_v9, 16  ;;  %v548_v24 = vor.u32 %v547_v10, %v543_v16  ;;  %v564_v32 = vrot.slane %v562_v21, 1  ;;  %v974_v43 = vrot.slane %v2145_v9, 1  ;;  %v1950_v10 = vld [vmem:[%s2422_s3 + $0x88] sm:$0xff]   ;;  %v1953_v16 = vld [vmem:[%s2422_s3 + $0x170] sm:$0xff]   ;;  %v1957_v21 = vld [vmem:[%s2422_s3 + $0x180] sm:$0xff]  }
  0x92   :  { %v694_v15 = vshll.u32 %v2143_v7, 16  ;;  %v692_v22 = vor.u32 %v691_v8, %v687_v12  ;;  %v708_v31 = vrot.slane %v706_v18, 1  ;;  %v1102_v42 = vrot.slane %v2143_v7, 1  ;;  %v1954_v18 = vld [vmem:[%s2422_s3 + $0x98] sm:$0xff]  }
  0x93   :  { %v552_v25 = vrot.slane %v550_v17, 1  ;;  %1723 = vmatpush3.bf16.msra.mxu1 %v1934_v61  ;;  %v2176_v37 = vsel %vm541_vm11, %v560_v34, %v564_v32  ;;  %v1101_v44 = vrot.slane %v2124_v60, 1  ;;  %v973_v45 = vrot.slane %v2122_v59, 1  ;;  %v1962_v27 = vld [vmem:[%s2422_s3 + $0xb8] sm:$0xff]   ;;  %v1966_v34 = vld [vmem:[%s2422_s3 + $0xc8] sm:$0xff]  }
  0x94   :  { %v696_v23 = vrot.slane %v694_v15, 1  ;;  %1724 = vmatprep.subr.bf16.mxu1 %v1936_v14  ;;  %v709_v36 = vsel %vm541_vm11, %v704_v33, %v708_v31  ;;  %v1105_v48 = vrot.slane %v2138_v4, 1  ;;  %v977_v49 = vrot.slane %v2149_v13, 1  ;;  %v1947_v4 = vld [vmem:[%s2422_s3 + $0x158] sm:$0xff]   ;;  %v1952_v15 = vld [vmem:[%s2422_s3 + $0x90] sm:$0xff]   ;;  %v1965_v31 = vld [vmem:[%s2422_s3 + $0x1a0] sm:$0xff]  }
  0x95   :  { %v2166_v30 = vsel %vm541_vm11, %v548_v24, %v552_v25  ;;  %v1103_v46 = vsel %vm972_vm12, %v1101_v44, %v1102_v42  ;;  %v2222_v47 = vsel %vm972_vm12, %v973_v45, %v974_v43  ;;  %v1959_v24 = vld [vmem:[%s2422_s3 + $0x188] sm:$0xff]   ;;  %v1960_v25 = vld [vmem:[%s2422_s3 + $0xb0] sm:$0xff]   ;;  %v1973_v42 = vld [vmem:[%s2422_s3 + $0x1c0] sm:$0xff]  }
  0x96   :  { %v697_v29 = vsel %vm541_vm11, %v692_v22, %v696_v23  ;;  %727 = vrot.lane.b32.xlu0 %v2166_v30, %s1994_s27  ;;  %v1106_v52 = vsel %vm972_vm12, %v1104_v50, %v1105_v48  ;;  %v2231_v53 = vsel %vm972_vm12, %v976_v51, %v977_v49  ;;  %v1958_v22 = vld [vmem:[%s2422_s3 + $0xa8] sm:$0xff]   ;;  %v1976_v48 = vld [vmem:[%s2422_s3 + $0xf0] sm:$0xff]   ;;  %v1978_v50 = vld [vmem:[%s2422_s3 + $0xf8] sm:$0xff]  }
  0x97   :  { %729 = vrot.lane.b32.xlu1 %v697_v29, %s1994_s27  ;;  %1725 = vmatpush3.bf16.msra.mxu1 %v1936_v14  ;;  %v1974_v45 = vld [vmem:[%s2422_s3 + $0xe8] sm:$0xff]   ;;  %v1977_v49 = vld [vmem:[%s2422_s3 + $0x1d0] sm:$0xff]   ;;  %v1979_v51 = vld [vmem:[%s2422_s3 + $0x1d8] sm:$0xff]  }
  0x98   :  { %1726 = vmatprep.subr.bf16.mxu1 %v1938_v28 }
  0x9a   :  { %731 = vrot.lane.b32.xlu0 %v2176_v37, %s1994_s27 }
  0x9b   :  { %733 = vrot.lane.b32.xlu1 %v709_v36, %s1994_s27  ;;  %1727 = vmatpush3.bf16.msra.mxu1 %v1938_v28  ;;  %v1963_v28 = vld [vmem:[%s2422_s3 + $0x198] sm:$0xff]  }
  0x9c   :  { %1728 = vmatprep.subr.bf16.mxu1 %v1940_v35 }
  0x9e   :  { %857 = vrot.lane.b32.xlu0 %v2166_v30, %s1995_s9 }
  0x9f   :  { %859 = vrot.lane.b32.xlu1 %v697_v29, %s1995_s9  ;;  %1729 = vmatpush3.bf16.msra.mxu1 %v1940_v35  ;;  %v1964_v29 = vld [vmem:[%s2422_s3 + $0xc0] sm:$0xff]  }
  0xa0   :  { %1730 = vmatprep.subr.bf16.mxu1 %v1942_v38 }
  0xa2   :  { %861 = vrot.lane.b32.xlu0 %v2176_v37, %s1995_s9 }
  0xa3   :  { %863 = vrot.lane.b32.xlu1 %v709_v36, %s1995_s9  ;;  %1731 = vmatpush3.bf16.msra.mxu1 %v1942_v38  ;;  %v1967_v36 = vld [vmem:[%s2422_s3 + $0x1a8] sm:$0xff]   ;;  %v1968_v38 = vld [vmem:[%s2422_s3 + $0xd0] sm:$0xff]  }
  0xa4   :  { %1732 = vmatprep.subr.bf16.mxu1 %v1944_v39 }
  0xa6   :  { %296 = vrot.lane.b32.xlu0 %v2122_v59, %s1994_s27 }
  0xa7   :  { %298 = vrot.lane.b32.xlu1 %v2124_v60, %s1994_s27  ;;  %1733 = vmatpush3.bf16.msra.mxu1 %v1944_v39  ;;  %v1969_v39 = vld [vmem:[%s2422_s3 + $0x1b0] sm:$0xff]  }
  0xa8   :  { %1734 = vmatprep.subr.bf16.mxu1 %v1946_v40 }
  0xaa   :  { %300 = vrot.lane.b32.xlu0 %v2118_v55, %s1994_s27 }
  0xab   :  { %302 = vrot.lane.b32.xlu1 %v2120_v58, %s1994_s27  ;;  %1735 = vmatpush3.bf16.msra.mxu1 %v1946_v40  ;;  %v1970_v40 = vld [vmem:[%s2422_s3 + $0xd8] sm:$0xff]  }
  0xac   :  { %1740 = vmatprep.subr.bf16.mxu1 %v2203_v41 }
  0xae   :  { %427 = vrot.lane.b32.xlu0 %v2122_v59, %s1995_s9  ;;  %v1943_v59 = vld [vmem:[%s2422_s3 + $0x148] sm:$0xff]  }
  0xaf   :  { %429 = vrot.lane.b32.xlu1 %v2124_v60, %s1995_s9 }
  0xb2   :  { %431 = vrot.lane.b32.xlu0 %v2118_v55, %s1995_s9 }
  0xb3   :  { %433 = vrot.lane.b32.xlu1 %v2120_v58, %s1995_s9 }
  0xb6   :  { %1124 = vrot.lane.b32.xlu0 %v2222_v47, %s1994_s27 }
  0xb7   :  { %1126 = vrot.lane.b32.xlu1 %v1103_v46, %s1994_s27 }
  0xba   :  { %1128 = vrot.lane.b32.xlu0 %v2231_v53, %s1994_s27 }
  0xbb   :  { %1130 = vrot.lane.b32.xlu1 %v1106_v52, %s1994_s27 }
  0xbe   :  { %1254 = vrot.lane.b32.xlu0 %v2222_v47, %s1995_s9 }
  0xbf   :  { %1256 = vrot.lane.b32.xlu1 %v1103_v46, %s1995_s9  ;;  %v1975_v46 = vld [vmem:[%s2422_s3 + $0x1c8] sm:$0xff]  }
  0xc2   :  { %1258 = vrot.lane.b32.xlu0 %v2231_v53, %s1995_s9 }
  0xc3   :  { %1260 = vrot.lane.b32.xlu1 %v1106_v52, %s1995_s9  ;;  %v1980_v52 = vld [vmem:[%s2422_s3 + $0x1e0] sm:$0xff]  }
 0x108   :  { %v728_v55 = vpop.permute.xlu0 %727 }
 0x109   :  { %v730_v54 = vpop.permute.xlu1 %729 }
 0x10a   :  { %v735_v56 = vsel %vm304_vm13, %v728_v55, %v730_v54  ;;  %v1982_v54 = vld [vmem:[%s2422_s3 + $0x1f0] sm:$0xff]   ;;  %v1983_v55 = vld [vmem:[%s2422_s3 + $0x1f8] sm:$0xff]  }
 0x10b   :  { %1796 = vmatprep.mubr.bf16.mxu0 %v735_v56 }
 0x10c   :  { %v732_v58 = vpop.permute.xlu0 %731 }
 0x10d   :  { %v734_v57 = vpop.permute.xlu1 %733 }
 0x10e   :  { %v736_v60 = vsel %vm304_vm13, %v732_v58, %v734_v57 }
 0x10f   :  { %1797 = vmatmul.mubr.bf16.vlgmr.msra.gmra.mrb[0].mxu0 %v736_v60  ;;  %v1985_v60 = vld [vmem:[%s2422_s3 + $0x208] sm:$0xff]  }
 0x110   :  { %1801 = vmatpush3.bf16.msra.mxu0 %v2132_v62  ;;  %v858_v63 = vpop.permute.xlu0 %857 }
 0x111   :  { %v860_v61 = vpop.permute.xlu1 %859  ;;  %1802 = vmatprep.subr.bf16.mxu0 %v1943_v59 }
 0x112   :  { %v865_v1 = vsel %vm435_vm14, %v858_v63, %v860_v61 }
 0x113   :  { %1816 = vmatprep.mubr.bf16.mxu0 %v865_v1  ;;  %v1987_v1 = vld [vmem:[%s2422_s3 + $0x218] sm:$0xff]  }
 0x114   :  { %1803 = vmatpush3.bf16.msra.mxu0 %v1943_v59  ;;  %v862_v3 = vpop.permute.xlu0 %861 }
 0x115   :  { %v864_v2 = vpop.permute.xlu1 %863  ;;  %1804 = vmatprep.subr.bf16.mxu0 %v1945_v0 }
 0x116   :  { %v866_v23 = vsel %vm435_vm14, %v862_v3, %v864_v2  ;;  %v1988_v2 = vld [vmem:[%s2422_s3 + $0x220] sm:$0xff]   ;;  %v1989_v3 = vld [vmem:[%s2422_s3 + $0x228] sm:$0xff]  }
 0x118   :  { %1805 = vmatpush3.bf16.msra.mxu0 %v1945_v0  ;;  %v297_v5 = vpop.permute.xlu0 %296  ;;  %v1986_v0 = vld [vmem:[%s2422_s3 + $0x210] sm:$0xff]  }
 0x119   :  { %v299_v62 = vpop.permute.xlu1 %298  ;;  %1806 = vmatprep.subr.bf16.mxu0 %v1947_v4 }
 0x11a   :  { %v305_v7 = vsel %vm304_vm13, %v297_v5, %v299_v62  ;;  %v1991_v62 = vld [vmem:[%s2422_s3 + $0x238] sm:$0xff]  }
 0x11b   :  { %1736 = vmatprep.mubr.bf16.mxu1 %v305_v7 }
 0x11c   :  { %1807 = vmatpush3.bf16.msra.mxu0 %v1947_v4  ;;  %v301_v9 = vpop.permute.xlu0 %300  ;;  %v1990_v4 = vld [vmem:[%s2422_s3 + $0x230] sm:$0xff]  }
 0x11d   :  { %v303_v8 = vpop.permute.xlu1 %302  ;;  %1808 = vmatprep.subr.bf16.mxu0 %v1949_v6 }
 0x11e   :  { %v306_v12 = vsel %vm304_vm13, %v301_v9, %v303_v8 }
 0x11f   :  { %1737 = vmatmul.mubr.bf16.vlgmr.msra.gmra.mrb[0].mxu1 %v306_v12  ;;  %v1409_v12 = vld [vmem:[%s2423_s4] ss:$0 sm:$0xff] }
 0x120   :  { %1741 = vmatpush3.bf16.msra.mxu1 %v2203_v41  ;;  %1809 = vmatpush3.bf16.msra.mxu0 %v1949_v6  ;;  %v428_v14 = vpop.permute.xlu0 %427  ;;  %v1972_v41 = vld [vmem:[%s2422_s3 + $0xe0] sm:$0xff]  }
 0x121   :  { %v430_v13 = vpop.permute.xlu1 %429  ;;  %1742 = vmatprep.subr.bf16.mxu1 %v1950_v10  ;;  %1810 = vmatprep.subr.bf16.mxu0 %v1951_v11 }
 0x122   :  { %v436_v17 = vsel %vm435_vm14, %v428_v14, %v430_v13 }
 0x123   :  { %1756 = vmatprep.mubr.bf16.mxu1 %v436_v17 }
 0x124   :  { %1743 = vmatpush3.bf16.msra.mxu1 %v1950_v10  ;;  %1811 = vmatpush3.bf16.msra.mxu0 %v1951_v11  ;;  %v432_v33 = vpop.permute.xlu0 %431 }
 0x125   :  { %1744 = vmatprep.subr.bf16.mxu1 %v1952_v15  ;;  %1812 = vmatprep.subr.bf16.mxu0 %v1953_v16  ;;  %v434_v32 = vpop.permute.xlu1 %433 }
 0x126   :  { %v437_v35 = vsel %vm435_vm14, %v432_v33, %v434_v32 }
 0x128   :  { %1745 = vmatpush3.bf16.msra.mxu1 %v1952_v15  ;;  %1813 = vmatpush3.bf16.msra.mxu0 %v1953_v16  ;;  %v1125_v44 = vpop.permute.xlu0 %1124 }
 0x129   :  { %1746 = vmatprep.subr.bf16.mxu1 %v1954_v18  ;;  %1814 = vmatprep.subr.bf16.mxu0 %v1955_v19  ;;  %v1127_v43 = vpop.permute.xlu1 %1126 }
 0x12c   :  { %1747 = vmatpush3.bf16.msra.mxu1 %v1954_v18  ;;  %1815 = vmatpush3.bf16.msra.mxu0 %v1955_v19  ;;  %v1129_v57 = vpop.permute.xlu0 %1128 }
 0x12d   :  { %1748 = vmatprep.subr.bf16.mxu1 %v1956_v20  ;;  %1820 = vmatprep.subr.bf16.mxu0 %v1957_v21  ;;  %v1131_v56 = vpop.permute.xlu1 %1130 }
 0x12e   :  { %v1133_v61 = vsel %vm304_vm13, %v1129_v57, %v1131_v56 }
 0x12f   :  { %1817 = vmatmul.mubr.bf16.vlgmr.msra.gmra.mrb[0].mxu0 %v866_v23 }
 0x130   :  { %1749 = vmatpush3.bf16.msra.mxu1 %v1956_v20  ;;  %1821 = vmatpush3.bf16.msra.mxu0 %v1957_v21  ;;  %v1255_v59 = vpop.permute.xlu0 %1254 }
 0x131   :  { %1836 = vmatprep.mubr.bf16.mxu0 %v2222_v47  ;;  %1750 = vmatprep.subr.bf16.mxu1 %v1958_v22  ;;  %v1132_v47 = vsel %vm304_vm13, %v1125_v44, %v1127_v43  ;;  %v1257_v58 = vpop.permute.xlu1 %1256 }
 0x132   :  { %1822 = vmatprep.subr.bf16.mxu0 %v1959_v24  ;;  %v1262_v63 = vsel %vm435_vm14, %v1255_v59, %v1257_v58 }
 0x134   :  { %1751 = vmatpush3.bf16.msra.mxu1 %v1958_v22  ;;  %1823 = vmatpush3.bf16.msra.mxu0 %v1959_v24  ;;  %v1259_v6 = vpop.permute.xlu0 %1258 }
 0x135   :  { %1752 = vmatprep.subr.bf16.mxu1 %v1960_v25  ;;  %1824 = vmatprep.subr.bf16.mxu0 %v1961_v26  ;;  %v1261_v5 = vpop.permute.xlu1 %1260 }
 0x136   :  { %v1263_v7 = vsel %vm435_vm14, %v1259_v6, %v1261_v5 }
 0x138   :  { %1753 = vmatpush3.bf16.msra.mxu1 %v1960_v25  ;;  %1825 = vmatpush3.bf16.msra.mxu0 %v1961_v26 }
 0x139   :  { %1754 = vmatprep.subr.bf16.mxu1 %v1962_v27  ;;  %1826 = vmatprep.subr.bf16.mxu0 %v1963_v28 }
 0x13c   :  { %1755 = vmatpush3.bf16.msra.mxu1 %v1962_v27  ;;  %1827 = vmatpush3.bf16.msra.mxu0 %v1963_v28 }
 0x13d   :  { %1760 = vmatprep.subr.bf16.mxu1 %v1964_v29  ;;  %1828 = vmatprep.subr.bf16.mxu0 %v1965_v31 }
 0x13f   :  { %1757 = vmatmul.mubr.bf16.vlgmr.msra.gmra.mrb[0].mxu1 %v437_v35 }
 0x140   :  { %1761 = vmatpush3.bf16.msra.mxu1 %v1964_v29  ;;  %1776 = vmatprep.mubr.bf16.mxu1 %v2166_v30  ;;  %v1971_v30 = vld [vmem:[%s2422_s3 + $0x1b8] sm:$0xff]  }
 0x141   :  { %1829 = vmatpush3.bf16.msra.mxu0 %v1965_v31  ;;  %1762 = vmatprep.subr.bf16.mxu1 %v1966_v34 }
 0x142   :  { %1830 = vmatprep.subr.bf16.mxu0 %v1967_v36 }
 0x144   :  { %1763 = vmatpush3.bf16.msra.mxu1 %v1966_v34 }
 0x145   :  { %1831 = vmatpush3.bf16.msra.mxu0 %v1967_v36  ;;  %1764 = vmatprep.subr.bf16.mxu1 %v1968_v38 }
 0x146   :  { %1832 = vmatprep.subr.bf16.mxu0 %v1969_v39 }
 0x148   :  { %1765 = vmatpush3.bf16.msra.mxu1 %v1968_v38 }
 0x149   :  { %1833 = vmatpush3.bf16.msra.mxu0 %v1969_v39  ;;  %1766 = vmatprep.subr.bf16.mxu1 %v1970_v40 }
 0x14a   :  { %1834 = vmatprep.subr.bf16.mxu0 %v1971_v30 }
 0x14c   :  { %1767 = vmatpush3.bf16.msra.mxu1 %v1970_v40 }
 0x14d   :  { %1835 = vmatpush3.bf16.msra.mxu0 %v1971_v30  ;;  %1768 = vmatprep.subr.bf16.mxu1 %v1972_v41 }
 0x14e   :  { %1840 = vmatprep.subr.bf16.mxu0 %v1973_v42 }
 0x150   :  { %1837 = vmatmul.mubr.bf16.vlgmr.msra.gmra.mrb[0].mxu0 %v2231_v53  ;;  %1769 = vmatpush3.bf16.msra.mxu1 %v1972_v41  ;;  %v1981_v53 = vld [vmem:[%s2422_s3 + $0x1e8] sm:$0xff]  }
 0x151   :  { %1841 = vmatpush3.bf16.msra.mxu0 %v1973_v42  ;;  %1856 = vmatprep.mubr.bf16.mxu0 %v1132_v47 }
 0x152   :  { %1770 = vmatprep.subr.bf16.mxu1 %v1974_v45  ;;  %1842 = vmatprep.subr.bf16.mxu0 %v1975_v46 }
 0x154   :  { %1771 = vmatpush3.bf16.msra.mxu1 %v1974_v45 }
 0x155   :  { %1843 = vmatpush3.bf16.msra.mxu0 %v1975_v46  ;;  %1772 = vmatprep.subr.bf16.mxu1 %v1976_v48 }
 0x156   :  { %1844 = vmatprep.subr.bf16.mxu0 %v1977_v49 }
 0x158   :  { %1773 = vmatpush3.bf16.msra.mxu1 %v1976_v48 }
 0x159   :  { %1845 = vmatpush3.bf16.msra.mxu0 %v1977_v49  ;;  %1774 = vmatprep.subr.bf16.mxu1 %v1978_v50 }
 0x15a   :  { %1846 = vmatprep.subr.bf16.mxu0 %v1979_v51 }
 0x15c   :  { %1775 = vmatpush3.bf16.msra.mxu1 %v1978_v50 }
 0x15d   :  { %1847 = vmatpush3.bf16.msra.mxu0 %v1979_v51 }
 0x15e   :  { %1848 = vmatprep.subr.bf16.mxu0 %v1980_v52 }
 0x15f   :  { %1777 = vmatmul.mubr.bf16.vlgmr.msra.gmra.mrb[0].mxu1 %v2176_v37  ;;  %v1984_v37 = vld [vmem:[%s2422_s3 + $0x200] sm:$0xff]  }
 0x161   :  { %1849 = vmatpush3.bf16.msra.mxu0 %v1980_v52 }
 0x162   :  { %1850 = vmatprep.subr.bf16.mxu0 %v1981_v53 }
 0x165   :  { %1851 = vmatpush3.bf16.msra.mxu0 %v1981_v53 }
 0x166   :  { %1852 = vmatprep.subr.bf16.mxu0 %v1982_v54 }
 0x169   :  { %1853 = vmatpush3.bf16.msra.mxu0 %v1982_v54 }
 0x16a   :  { %1854 = vmatprep.subr.bf16.mxu0 %v1983_v55 }
 0x16d   :  { %1855 = vmatpush3.bf16.msra.mxu0 %v1983_v55 }
 0x16e   :  { %1860 = vmatprep.subr.bf16.mxu0 %v1984_v37 }
 0x170   :  { %1857 = vmatmul.mubr.bf16.vlgmr.msra.gmra.mrb[0].mxu0 %v1133_v61 }
 0x171   :  { %1861 = vmatpush3.bf16.msra.mxu0 %v1984_v37  ;;  %1876 = vmatprep.mubr.bf16.mxu0 %v1262_v63 }
 0x172   :  { %1862 = vmatprep.subr.bf16.mxu0 %v1985_v60 }
 0x175   :  { %1863 = vmatpush3.bf16.msra.mxu0 %v1985_v60 }
 0x176   :  { %1864 = vmatprep.subr.bf16.mxu0 %v1986_v0 }
 0x179   :  { %1865 = vmatpush3.bf16.msra.mxu0 %v1986_v0 }
 0x17a   :  { %1866 = vmatprep.subr.bf16.mxu0 %v1987_v1 }
 0x17d   :  { %1867 = vmatpush3.bf16.msra.mxu0 %v1987_v1 }
 0x17e   :  { %1868 = vmatprep.subr.bf16.mxu0 %v1988_v2 }
 0x181   :  { %1869 = vmatpush3.bf16.msra.mxu0 %v1988_v2 }
 0x182   :  { %1870 = vmatprep.subr.bf16.mxu0 %v1989_v3 }
 0x185   :  { %1871 = vmatpush3.bf16.msra.mxu0 %v1989_v3 }
 0x186   :  { %1872 = vmatprep.subr.bf16.mxu0 %v1990_v4 }
 0x189   :  { %1873 = vmatpush3.bf16.msra.mxu0 %v1990_v4 }
 0x18a   :  { %1874 = vmatprep.subr.bf16.mxu0 %v1991_v62 }
 0x18d   :  { %1875 = vmatpush3.bf16.msra.mxu0 %v1991_v62 }
 0x190   :  { %1877 = vmatmul.mubr.bf16.vlgmr.msra.gmra.mrb[0].mxu0 %v1263_v7 }
 0x232   :  { %v1778_v8 = vpop.f32.mrb[0].mxu1 }
 0x233   :  { %v667_v9 = vpop.f32.mrb[1].mxu1  ;;  %v1880_v13 = vadd.f32 %v1778_v8, %v1409_v12 }
 0x234   :  { %v1779_v10 = vpop.f32.mrb[2].mxu1  ;;  %v1882_v14 = vadd.f32 %v1409_v12, %v667_v9 }
 0x235   :  { %v670_v11 = vpop.f32.mrb[3].mxu1  ;;  %v1884_v16 = vadd.f32 %v1779_v10, %v1409_v12 }
 0x236   :  { %v1886_v19 = vadd.f32 %v1409_v12, %v670_v11 }
 0x263   :  { %v1878_v15 = vpop.f32.mrb[0].mxu0 }
 0x264   :  { %v1881_v17 = vadd.f32 %v1880_v13, %v1878_v15  ;;  %v1348_v18 = vpop.f32.mrb[1].mxu0 }
 0x265   :  { %v1883_v20 = vadd.f32 %v1882_v14, %v1348_v18  ;;  %v1879_v21 = vpop.f32.mrb[2].mxu0 }
 0x266   :  { %1369 = vst [vmem:[%s2424_s5 + $0x10] sm:$0xff] %v1881_v17  ;;  %v1885_v22 = vadd.f32 %v1884_v16, %v1879_v21  ;;  %v1351_v23 = vpop.f32.mrb[3].mxu0  ;;  %v1383_v28 = vmul.f32 %v1881_v17, %v1881_v17 }
 0x267   :  { %1367 = vst [vmem:[%s2424_s5] sm:$0xff] %v1883_v20  ;;  %v1887_v24 = vadd.f32 %v1886_v19, %v1351_v23  ;;  %v1381_v25 = vmul.f32 %v1883_v20, %v1883_v20 }
 0x268   :  { %1370 = vst [vmem:[%s2424_s5 + $0x18] sm:$0xff] %v1885_v22  ;;  %v1384_v32 = vmul.f32 %v1885_v22, %v1885_v22 }
 0x269   :  { %1368 = vst [vmem:[%s2424_s5 + $0x8] sm:$0xff] %v1887_v24  ;;  %v1371_v26 = vadd.f32 %v1887_v24, %v1883_v20  ;;  %v1382_v27 = vmul.f32 %v1887_v24, %v1887_v24 }
 0x26b   :  { %v1372_v29 = vadd.f32 %v1881_v17, %v1371_v26  ;;  %v1385_v31 = vadd.f32 %v1382_v27, %v1381_v25 }
 0x26d   :  { %v1373_v33 = vadd.f32 %v1885_v22, %v1372_v29  ;;  %v1386_v34 = vadd.f32 %v1385_v31, %v1383_v28 }
 0x26f   :  { %v1374_v35 = vrot.slane %v1373_v33, 4  ;;  %v1387_v36 = vadd.f32 %v1386_v34, %v1384_v32 }
 0x271   :  { %v1375_v38 = vadd.f32 %v1374_v35, %v1373_v33  ;;  %v1388_v39 = vrot.slane %v1387_v36, 4 }
 0x273   :  { %v1376_v40 = vrot.slane %v1375_v38, 2  ;;  %v1389_v30 = vadd.f32 %v1388_v39, %v1387_v36 }
 0x275   :  { %v1377_v41 = vadd.f32 %v1376_v40, %v1375_v38  ;;  %v1390_v42 = vrot.slane %v1389_v30, 2 }
 0x277   :  { %v1378_v43 = vrot.slane %v1377_v41, 1  ;;  %v1391_v44 = vadd.f32 %v1390_v42, %v1389_v30 }
 0x279   :  { %v1379_v45 = vadd.f32 %v1378_v43, %v1377_v41  ;;  %v1392_v46 = vrot.slane %v1391_v44, 1 }
 0x27b   :  { %1380 = vst [vmem:[%s2425_s6] sm:$0x1] %v1379_v45  ;;  %v1393_v47 = vadd.f32 %v1392_v46, %v1391_v44 }
 0x27d   :  { %1394 = vst [vmem:[%s2426_s7] sm:$0x1] %v1393_v47 }

// kernel: conv_block_forward.5
= control target key start
LH: loop header
LB: loop body
LE: loop exit
PB: predicated region body
PF: predicated region fallthrough
CT: control target
= control target key end

     0   :  { %s104_s0 = inlined_call_operand.vmem [shape: f32[2,16,128], index: 0, kind: input, shape index: {}]   ;;  %s105_s1 = inlined_call_operand.vmem [shape: f32[1,128], index: 1, kind: input, shape index: {}]   ;;  %s106_s2 = inlined_call_operand.vmem [shape: f32[1,128], index: 2, kind: input, shape index: {}]   ;;  %s107_s3 = inlined_call_operand.vmem [shape: f32[2,16,128], index: 3, kind: output, shape index: {}]  }
   0x1   :  { %v14_v0 = vld [vmem:[%s104_s0] sm:$0xff]  ;;  %v15_v4 = vld [vmem:[%s104_s0 + $0x8] sm:$0xff]  ;;  %v16_v5 = vld [vmem:[%s104_s0 + $0x10] sm:$0xff] }
   0x2   :  { %v52_v1 = vld [vmem:[%s105_s1] ss:$0 sm:$0xff]  ;;  %v17_v6 = vld [vmem:[%s104_s0 + $0x18] sm:$0xff] }
   0x3   :  { %v53_v2 = vld [vmem:[%s106_s2] ss:$0 sm:$0xff]  ;;  %v25_v3 = vmul.f32 %v52_v1, %v14_v0  ;;  %v26_v7 = vmul.f32 %v52_v1, %v15_v4  ;;  %v27_v8 = vmul.f32 %v52_v1, %v16_v5  ;;  %v28_v9 = vmul.f32 %v52_v1, %v17_v6 }
   0x5   :  { %v36_v10 = vadd.f32 %v53_v2, %v25_v3  ;;  %v37_v11 = vadd.f32 %v53_v2, %v26_v7  ;;  %v38_v12 = vadd.f32 %v53_v2, %v27_v8  ;;  %v39_v13 = vadd.f32 %v53_v2, %v28_v9 }
   0x7   :  { %v40_v14 = vmax.f32 %v36_v10, 0.0  ;;  %v41_v15 = vmax.f32 %v37_v11, 0.0  ;;  %v42_v16 = vmax.f32 %v38_v12, 0.0  ;;  %v43_v17 = vmax.f32 %v39_v13, 0.0 }
   0x9   :  { %44 = vst [vmem:[%s107_s3] sm:$0xff] %v40_v14  ;;  %45 = vst [vmem:[%s107_s3 + $0x8] sm:$0xff] %v41_v15 }
   0xa   :  { %46 = vst [vmem:[%s107_s3 + $0x10] sm:$0xff] %v42_v16  ;;  %47 = vst [vmem:[%s107_s3 + $0x18] sm:$0xff] %v43_v17 }

</bundles_post_ra>
